<compile_context>
chip_gen: v7x
topology: tpu7x:2x2x1
jax: 0.10.0
libtpu: 0.0.40
codegen_flags: <defaults>
</compile_context>

<pallas_src>
import jax
import jax.numpy as jnp
from jax import lax
from jax.experimental import pallas as pl
from jax.experimental.pallas import tpu as pltpu


def gnn_kernel(a_ref, xs_ref, dis_ref, w1t_ref, w2t_ref, wfct_ref, bfc_ref,
               out_ref, h1s_ref, aggx_ref, aggh_ref, acc_ref):
    phase = pl.program_id(0)          # 0: conv1, 1: conv2 + pool (+ fc at the very end)
    i = pl.program_id(1)              # row-block index
    k = pl.program_id(2)              # column (neighbor) block index
    nk = pl.num_programs(2)
    tile_n, tile_k = a_ref.shape

    # a_hat entries are small integer counts stored as int8: per-block upcast is
    # exact and only (tile_n, tile_k) f32 large (budgeted).
    a_blk = a_ref[...].astype(jnp.float32)                 # (tile_n, tile_k)
    dis_blk = dis_ref[...]                                 # (tile_n, 1)

    @pl.when(phase == 0)
    def _conv1():
        @pl.when(k == 0)
        def _():
            aggx_ref[...] = jnp.zeros_like(aggx_ref)

        # partial (A+I)[i-block, k-block] @ (D^-1/2 x)[k-block]
        aggx_ref[...] += jnp.dot(a_blk, xs_ref[...],
                                 preferred_element_type=jnp.float32)

        @pl.when(k == nk - 1)
        def _():
            agg = dis_blk * aggx_ref[...]                  # D^-1/2 (A+I) D^-1/2 x
            h1 = jnp.maximum(
                jnp.dot(agg, w1t_ref[...],
                        preferred_element_type=jnp.float32), 0.0)
            row0 = pl.multiple_of(i * tile_n, tile_n)
            # store pre-scaled by D^-1/2 so conv2 is a plain matmul against it
            h1s_ref[pl.ds(row0, tile_n), :] = dis_blk * h1

    @pl.when(phase == 1)
    def _conv2_pool():
        @pl.when(k == 0)
        def _():
            aggh_ref[...] = jnp.zeros_like(aggh_ref)

        col0 = pl.multiple_of(k * tile_k, tile_k)
        aggh_ref[...] += jnp.dot(a_blk, h1s_ref[pl.ds(col0, tile_k), :],
                                 preferred_element_type=jnp.float32)

        @pl.when(k == nk - 1)
        def _():
            @pl.when(i == 0)
            def _():
                acc_ref[...] = jnp.zeros_like(acc_ref)

            agg = dis_blk * aggh_ref[...]
            h2 = jnp.maximum(
                jnp.dot(agg, w2t_ref[...],
                        preferred_element_type=jnp.float32), 0.0)
            acc_ref[...] += jnp.sum(h2, axis=0, keepdims=True)   # padded rows are 0

            @pl.when(i == pl.num_programs(1) - 1)
            def _():
                # mean(h2, dim=0) @ Wfc^T + b : the 1/N is folded into wfct on host.
                out_ref[...] = (
                    jnp.dot(acc_ref[...], wfct_ref[...],
                            preferred_element_type=jnp.float32) + bfc_ref[...])


def _round_up(v, m):
    return (v + m - 1) // m * m


def _padded_bytes(rows, cols, itemsize, sublane):
    """VMEM footprint of one buffer including lane(128)/sublane layout padding."""
    return _round_up(max(rows, 1), sublane) * _round_up(max(cols, 1), 128) * itemsize


def matrix_predictor_gnn(x, edge_index, params, out_channels, *,
                         tile_n=256, tile_k=512):
    """x: (N, Cin) f32, edge_index: (2, E) int32. Returns (out_channels, out_channels)."""
    n, cin = x.shape
    hid = params["w1"].shape[0]
    oo = out_channels * out_channels
    oo_pad = _round_up(oo, 128)               # lane-dense fc output, sliced outside

    # ---- JAX glue: dense normalized adjacency pieces (scatter-add) ----
    # TODO(synk): edge_index -> dense adjacency scatter-add has no clean Pallas/TPU
    #   scatter; it stays in XLA.
    src, dst = edge_index[0], edge_index[1]
    adj = jnp.zeros((n, n), jnp.float32).at[src, dst].add(1.0)
    a_hat = adj + jnp.eye(n, dtype=jnp.float32)                  # A (with multiplicity) + I
    deg = jnp.zeros((n,), jnp.float32).at[src].add(1.0) + 1.0    # == row-sums of a_hat
    dis = jnp.where(deg > 0.0, lax.rsqrt(deg), 0.0).reshape(n, 1)

    # int8 storage is exact while edge multiplicity + self-loop <= 127.
    try:
        max_entry = int(jnp.max(a_hat))
    except Exception:   # traced (e.g. under jit): skip the host-side check
        max_entry = None
    if max_entry is not None and max_entry > 127:
        raise ValueError("a_hat entries exceed int8 range (127); multigraph too dense")

    # ---- padding: columns to a tile_k multiple (tile_k capped at a 128-multiple of N),
    #      rows to a tile_n multiple >= the column extent so every h1s row that is read
    #      in phase 1 was written (to zero) in phase 0. ----
    tile_k = min(tile_k, _round_up(n, 128))
    n_pad_c = _round_up(n, tile_k)
    tile_n = min(tile_n, n_pad_c)             # stays a multiple of 32 (int8 sublane pack)
    n_pad_r = _round_up(n_pad_c, tile_n)

    a_hat_p = jnp.pad(a_hat, ((0, n_pad_r - n), (0, n_pad_c - n))).astype(jnp.int8)
    dis_p = jnp.pad(dis, ((0, n_pad_r - n), (0, 0)))
    xs_p = jnp.pad(dis * x.astype(jnp.float32), ((0, n_pad_c - n), (0, 0)))  # D^-1/2 x

    w1t = params["w1"].T.astype(jnp.float32)                             # (cin, hid)
    w2t = params["w2"].T.astype(jnp.float32)                             # (hid, hid)
    wfct = params["wfc"].T.astype(jnp.float32) / jnp.float32(n)          # mean folded in
    wfct_p = jnp.pad(wfct, ((0, 0), (0, oo_pad - oo)))
    bfc_p = jnp.pad(params["bfc"].reshape(1, -1).astype(jnp.float32),
                    ((0, 0), (0, oo_pad - oo)))

    nb = n_pad_r // tile_n
    kb = n_pad_c // tile_k
    const = lambda p, i, k: (0, 0)

    grid_spec = pltpu.PrefetchScalarGridSpec(
        num_scalar_prefetch=0,
        grid=(2, nb, kb),                                        # (phase, row blk, col blk)
        in_specs=[
            pl.BlockSpec((tile_n, tile_k), lambda p, i, k: (i, k)),  # a_hat (int8, pipelined)
            pl.BlockSpec((tile_k, cin), lambda p, i, k: (k, 0)),     # D^-1/2 x  (per col blk)
            pl.BlockSpec((tile_n, 1), lambda p, i, k: (i, 0)),       # D^-1/2    (per row blk)
            pl.BlockSpec((cin, hid), const),                         # W1^T      (resident)
            pl.BlockSpec((hid, hid), const),                         # W2^T      (resident)
            pl.BlockSpec((hid, oo_pad), const),                      # Wfc^T / N (resident)
            pl.BlockSpec((1, oo_pad), const),                        # bias      (resident)
        ],
        out_specs=pl.BlockSpec((1, oo_pad), const),
        scratch_shapes=[
            pltpu.VMEM((n_pad_r, hid), jnp.float32),   # D^-1/2 h1 (lives across phases)
            pltpu.VMEM((tile_n, cin), jnp.float32),    # conv1 K-partial accumulator
            pltpu.VMEM((tile_n, hid), jnp.float32),    # conv2 K-partial accumulator
            pltpu.VMEM((1, hid), jnp.float32),         # pooled node-sum accumulator
        ],
    )

    # ---- layout-aware VMEM budget (lane=128, sublane=8 f32 / 32 int8; 2x = dbl buf) ----
    est = (
        2 * _padded_bytes(tile_n, tile_k, 1, 32)       # a_hat block (int8)
        + 2 * _padded_bytes(tile_k, cin, 4, 8)         # xs block
        + 2 * _padded_bytes(tile_n, 1, 4, 8)           # dis block
        + 2 * _padded_bytes(cin, hid, 4, 8)            # W1^T
        + 2 * _padded_bytes(hid, hid, 4, 8)            # W2^T
        + 2 * _padded_bytes(hid, oo_pad, 4, 8)         # Wfc^T
        + 2 * _padded_bytes(1, oo_pad, 4, 8)           # bias
        + 2 * _padded_bytes(1, oo_pad, 4, 8)           # output block
        + _padded_bytes(n_pad_r, hid, 4, 8)            # h1s scratch
        + _padded_bytes(tile_n, cin, 4, 8)             # aggx scratch
        + _padded_bytes(tile_n, hid, 4, 8)             # aggh scratch
        + _padded_bytes(1, hid, 4, 8)                  # acc scratch
        + _padded_bytes(tile_n, tile_k, 4, 8)          # in-kernel f32 upcast of one block
        + 4 * _padded_bytes(tile_n, hid, 4, 8)         # misc elementwise temps
    )
    try:
        cap = int(0.85 * pltpu.get_tpu_info().vmem_capacity_bytes)
    except Exception:
        cap = 64 * 1024 * 1024
    vmem_limit = int(min(cap, max(4 * 1024 * 1024, int(1.5 * est))))

    out = pl.pallas_call(
        gnn_kernel,
        out_shape=jax.ShapeDtypeStruct((1, oo_pad), jnp.float32),
        grid_spec=grid_spec,
        compiler_params=pltpu.CompilerParams(
            # Every axis carries cross-step state (h1s scratch / K accumulators / pooled
            # sum) -> sequential.
            # TODO(synk): batch several graphs on a leading "parallel" axis to use the
            #   second v7x TensorCore; single-graph inference stays serial.
            dimension_semantics=("arbitrary", "arbitrary", "arbitrary"),
            vmem_limit_bytes=vmem_limit,
        ),
    )(a_hat_p, xs_p, dis_p, w1t, w2t, wfct_p, bfc_p)

    return out[0, :oo].reshape(out_channels, out_channels)


def reference_forward(x, edge_index, params, out_channels):
    """Pure-JAX mirror of the PyTorch forward (scatter-add formulation)."""
    n = x.shape[0]

    def gcn(h, w):
        ar = jnp.arange(n, dtype=edge_index.dtype)
        ei = jnp.concatenate([edge_index, jnp.stack([ar, ar])], axis=1)
        deg = jnp.zeros(n, jnp.float32).at[ei[0]].add(1.0)
        dis = jnp.where(deg == 0.0, 0.0, deg ** -0.5)
        norm = dis[ei[0]] * dis[ei[1]]
        msgs = h[ei[1]] * norm[:, None]
        agg = jnp.zeros_like(h).at[ei[0]].add(msgs)
        return agg @ w.T

    h = jax.nn.relu(gcn(x, params["w1"]))
    h = jax.nn.relu(gcn(h, params["w2"]))
    a_flat = jnp.mean(h, axis=0) @ params["wfc"].T + params["bfc"]
    return a_flat.reshape(out_channels, out_channels)


if __name__ == "__main__":
    N, E = 8, 16
    IN_CH, HID_CH, OUT_CH = 4, 32, 4

    key = jax.random.PRNGKey(0)
    k_x, k_e, k_w1, k_w2, k_wfc, k_bfc = jax.random.split(key, 6)

    x = jax.random.normal(k_x, (N, IN_CH), jnp.float32)
    edge_index = jax.random.randint(k_e, (2, E), 0, N, dtype=jnp.int32)

    params = {
        "w1": 0.1 * jax.random.normal(k_w1, (HID_CH, IN_CH), jnp.float32),   # Linear(in->hid), no bias
        "w2": 0.1 * jax.random.normal(k_w2, (HID_CH, HID_CH), jnp.float32),  # Linear(hid->hid), no bias
        "wfc": 0.1 * jax.random.normal(k_wfc, (OUT_CH * OUT_CH, HID_CH), jnp.float32),
        "bfc": 0.1 * jax.random.normal(k_bfc, (OUT_CH * OUT_CH,), jnp.float32),
    }

    out = matrix_predictor_gnn(x, edge_index, params, OUT_CH)
    out = jax.block_until_ready(out)

    ref = reference_forward(x, edge_index, params, OUT_CH)
    assert out.shape == (OUT_CH, OUT_CH)
    assert jnp.allclose(out, ref, rtol=1e-4, atol=1e-5), (out, ref)

    print("KERNEL_OK")
</pallas_src>

<mosaic_0001>
module attributes {stable_mosaic.version = 11 : i64} {
  func.func @gnn_kernel(%arg0: i32, %arg1: i32, %arg2: i32, %arg3: memref<128x128xi8, #tpu.memory_space<vmem>>, %arg4: memref<128x4xf32, #tpu.memory_space<vmem>>, %arg5: memref<128x1xf32, #tpu.memory_space<vmem>>, %arg6: memref<4x32xf32, #tpu.memory_space<vmem>>, %arg7: memref<32x32xf32, #tpu.memory_space<vmem>>, %arg8: memref<32x128xf32, #tpu.memory_space<vmem>>, %arg9: memref<1x128xf32, #tpu.memory_space<vmem>>, %arg10: memref<1x128xf32, #tpu.memory_space<vmem>>, %arg11: memref<128x32xf32, #tpu.memory_space<vmem>>, %arg12: memref<128x4xf32, #tpu.memory_space<vmem>>, %arg13: memref<128x32xf32, #tpu.memory_space<vmem>>, %arg14: memref<1x32xf32, #tpu.memory_space<vmem>>) attributes {dimension_semantics = [#tpu.dimension_semantics<arbitrary>, #tpu.dimension_semantics<arbitrary>, #tpu.dimension_semantics<arbitrary>], iteration_bounds = array<i64: 2, 1, 1>, scalar_prefetch = 0 : i64, scratch_operands = 4 : i64, tpu.core_type = #tpu.core_type<tc>, window_params = [{transform_indices = @transform_0, window_bounds = array<i64: 128, 128>}, {transform_indices = @transform_1, window_bounds = array<i64: 128, 4>}, {transform_indices = @transform_2, window_bounds = array<i64: 128, 1>}, {pipeline_mode = #tpu.pipeline_mode<synchronous>, transform_indices = @transform_3, window_bounds = array<i64: 4, 32>}, {pipeline_mode = #tpu.pipeline_mode<synchronous>, transform_indices = @transform_4, window_bounds = array<i64: 32, 32>}, {pipeline_mode = #tpu.pipeline_mode<synchronous>, transform_indices = @transform_5, window_bounds = array<i64: 32, 128>}, {pipeline_mode = #tpu.pipeline_mode<synchronous>, transform_indices = @transform_6, window_bounds = array<i64: 1, 128>}, {pipeline_mode = #tpu.pipeline_mode<synchronous>, transform_indices = @transform_7, window_bounds = array<i64: 1, 128>}]} {
    %c0 = arith.constant 0 : index
    %c0_0 = arith.constant 0 : index
    %0 = vector.load %arg3[%c0, %c0_0] : memref<128x128xi8, #tpu.memory_space<vmem>>, vector<128x128xi8>
    %1 = arith.sitofp %0 : vector<128x128xi8> to vector<128x128xf32>
    %c0_1 = arith.constant 0 : index
    %c0_2 = arith.constant 0 : index
    %2 = vector.load %arg5[%c0_1, %c0_2] : memref<128x1xf32, #tpu.memory_space<vmem>>, vector<128x1xf32>
    %c0_i32 = arith.constant 0 : i32
    %3 = arith.cmpi eq, %arg0, %c0_i32 : i32
    %4 = arith.extui %3 : i1 to i32
    %c0_i32_3 = arith.constant 0 : i32
    %5 = arith.cmpi ne, %4, %c0_i32_3 : i32
    scf.if %5 {
      %c0_i32_5 = arith.constant 0 : i32
      %9 = arith.cmpi eq, %arg2, %c0_i32_5 : i32
      %10 = arith.extui %9 : i1 to i32
      %c0_i32_6 = arith.constant 0 : i32
      %11 = arith.cmpi ne, %10, %c0_i32_6 : i32
      scf.if %11 {
        %cst_15 = arith.constant 0.000000e+00 : f32
        %20 = vector.broadcast %cst_15 : f32 to vector<128x4xf32>
        %c0_16 = arith.constant 0 : index
        %c0_17 = arith.constant 0 : index
        %21 = vector.load %arg12[%c0_16, %c0_17] : memref<128x4xf32, #tpu.memory_space<vmem>>, vector<128x4xf32>
        tpu.vector_store %arg12[%c0_16, %c0_17], %20 {strides = array<i32>} : memref<128x4xf32, #tpu.memory_space<vmem>>, vector<128x4xf32>,
      } else {
      }
      %c0_7 = arith.constant 0 : index
      %c0_8 = arith.constant 0 : index
      %12 = vector.load %arg12[%c0_7, %c0_8] : memref<128x4xf32, #tpu.memory_space<vmem>>, vector<128x4xf32>
      %c0_9 = arith.constant 0 : index
      %c0_10 = arith.constant 0 : index
      %13 = vector.load %arg4[%c0_9, %c0_10] : memref<128x4xf32, #tpu.memory_space<vmem>>, vector<128x4xf32>
      %cst = arith.constant dense<0.000000e+00> : vector<128x4xf32>
      %14 = tpu.matmul %1, %13, %cst {dimension_numbers = #tpu.dot_dimension_numbers<[1], [0], [0], [1], [0, 0, 1, 1], [], []>} : vector<128x128xf32>, vector<128x4xf32>, vector<128x4xf32> -> vector<128x4xf32>
      %15 = arith.addf %12, %14 : vector<128x4xf32>
      %c0_11 = arith.constant 0 : index
      %c0_12 = arith.constant 0 : index
      %16 = vector.load %arg12[%c0_11, %c0_12] : memref<128x4xf32, #tpu.memory_space<vmem>>, vector<128x4xf32>
      tpu.vector_store %arg12[%c0_11, %c0_12], %15 {strides = array<i32>} : memref<128x4xf32, #tpu.memory_space<vmem>>, vector<128x4xf32>,
      %c0_i32_13 = arith.constant 0 : i32
      %17 = arith.cmpi eq, %arg2, %c0_i32_13 : i32
      %18 = arith.extui %17 : i1 to i32
      %c0_i32_14 = arith.constant 0 : i32
      %19 = arith.cmpi ne, %18, %c0_i32_14 : i32
      scf.if %19 {
        %c0_15 = arith.constant 0 : index
        %c0_16 = arith.constant 0 : index
        %20 = vector.load %arg12[%c0_15, %c0_16] : memref<128x4xf32, #tpu.memory_space<vmem>>, vector<128x4xf32>
        %21 = vector.broadcast %2 : vector<128x1xf32> to vector<128x4xf32>
        %22 = arith.mulf %21, %20 : vector<128x4xf32>
        %c0_17 = arith.constant 0 : index
        %c0_18 = arith.constant 0 : index
        %23 = vector.load %arg6[%c0_17, %c0_18] : memref<4x32xf32, #tpu.memory_space<vmem>>, vector<4x32xf32>
        %cst_19 = arith.constant dense<0.000000e+00> : vector<128x32xf32>
        %24 = tpu.matmul %22, %23, %cst_19 {dimension_numbers = #tpu.dot_dimension_numbers<[1], [0], [0], [1], [0, 0, 1, 1], [], []>} : vector<128x4xf32>, vector<4x32xf32>, vector<128x32xf32> -> vector<128x32xf32>
        %cst_20 = arith.constant 0.000000e+00 : f32
        %25 = vector.broadcast %cst_20 : f32 to vector<128x32xf32>
        %26 = arith.maximumf %24, %25 : vector<128x32xf32>
        %c128_i32 = arith.constant 128 : i32
        %27 = arith.muli %arg1, %c128_i32 : i32
        %28 = tpu.assume_multiple %27, 128 : i32
        %29 = vector.broadcast %2 : vector<128x1xf32> to vector<128x32xf32>
        %30 = arith.mulf %29, %26 : vector<128x32xf32>
        %31 = arith.index_cast %28 : i32 to index
        %c0_21 = arith.constant 0 : index
        %32 = vector.load %arg11[%31, %c0_21] : memref<128x32xf32, #tpu.memory_space<vmem>>, vector<128x32xf32>
        tpu.vector_store %arg11[%31, %c0_21], %30 {strides = array<i32>} : memref<128x32xf32, #tpu.memory_space<vmem>>, vector<128x32xf32>,
      } else {
      }
    } else {
    }
    %c1_i32 = arith.constant 1 : i32
    %6 = arith.cmpi eq, %arg0, %c1_i32 : i32
    %7 = arith.extui %6 : i1 to i32
    %c0_i32_4 = arith.constant 0 : i32
    %8 = arith.cmpi ne, %7, %c0_i32_4 : i32
    scf.if %8 {
      %c0_i32_5 = arith.constant 0 : i32
      %9 = arith.cmpi eq, %arg2, %c0_i32_5 : i32
      %10 = arith.extui %9 : i1 to i32
      %c0_i32_6 = arith.constant 0 : i32
      %11 = arith.cmpi ne, %10, %c0_i32_6 : i32
      scf.if %11 {
        %cst_14 = arith.constant 0.000000e+00 : f32
        %23 = vector.broadcast %cst_14 : f32 to vector<128x32xf32>
        %c0_15 = arith.constant 0 : index
        %c0_16 = arith.constant 0 : index
        %24 = vector.load %arg13[%c0_15, %c0_16] : memref<128x32xf32, #tpu.memory_space<vmem>>, vector<128x32xf32>
        tpu.vector_store %arg13[%c0_15, %c0_16], %23 {strides = array<i32>} : memref<128x32xf32, #tpu.memory_space<vmem>>, vector<128x32xf32>,
      } else {
      }
      %c128_i32 = arith.constant 128 : i32
      %12 = arith.muli %arg2, %c128_i32 : i32
      %13 = tpu.assume_multiple %12, 128 : i32
      %c0_7 = arith.constant 0 : index
      %c0_8 = arith.constant 0 : index
      %14 = vector.load %arg13[%c0_7, %c0_8] : memref<128x32xf32, #tpu.memory_space<vmem>>, vector<128x32xf32>
      %15 = arith.index_cast %13 : i32 to index
      %c0_9 = arith.constant 0 : index
      %16 = vector.load %arg11[%15, %c0_9] : memref<128x32xf32, #tpu.memory_space<vmem>>, vector<128x32xf32>
      %cst = arith.constant dense<0.000000e+00> : vector<128x32xf32>
      %17 = tpu.matmul %1, %16, %cst {dimension_numbers = #tpu.dot_dimension_numbers<[1], [0], [0], [1], [0, 0, 1, 1], [], []>} : vector<128x128xf32>, vector<128x32xf32>, vector<128x32xf32> -> vector<128x32xf32>
      %18 = arith.addf %14, %17 : vector<128x32xf32>
      %c0_10 = arith.constant 0 : index
      %c0_11 = arith.constant 0 : index
      %19 = vector.load %arg13[%c0_10, %c0_11] : memref<128x32xf32, #tpu.memory_space<vmem>>, vector<128x32xf32>
      tpu.vector_store %arg13[%c0_10, %c0_11], %18 {strides = array<i32>} : memref<128x32xf32, #tpu.memory_space<vmem>>, vector<128x32xf32>,
      %c0_i32_12 = arith.constant 0 : i32
      %20 = arith.cmpi eq, %arg2, %c0_i32_12 : i32
      %21 = arith.extui %20 : i1 to i32
      %c0_i32_13 = arith.constant 0 : i32
      %22 = arith.cmpi ne, %21, %c0_i32_13 : i32
      scf.if %22 {
        %c0_i32_14 = arith.constant 0 : i32
        %23 = arith.cmpi eq, %arg1, %c0_i32_14 : i32
        %24 = arith.extui %23 : i1 to i32
        %c0_i32_15 = arith.constant 0 : i32
        %25 = arith.cmpi ne, %24, %c0_i32_15 : i32
        scf.if %25 {
          %cst_29 = arith.constant 0.000000e+00 : f32
          %41 = vector.broadcast %cst_29 : f32 to vector<1x32xf32>
          %c0_30 = arith.constant 0 : index
          %c0_31 = arith.constant 0 : index
          %42 = vector.load %arg14[%c0_30, %c0_31] : memref<1x32xf32, #tpu.memory_space<vmem>>, vector<1x32xf32>
          tpu.vector_store %arg14[%c0_30, %c0_31], %41 {strides = array<i32>} : memref<1x32xf32, #tpu.memory_space<vmem>>, vector<1x32xf32>,
        } else {
        }
        %c0_16 = arith.constant 0 : index
        %c0_17 = arith.constant 0 : index
        %26 = vector.load %arg13[%c0_16, %c0_17] : memref<128x32xf32, #tpu.memory_space<vmem>>, vector<128x32xf32>
        %27 = vector.broadcast %2 : vector<128x1xf32> to vector<128x32xf32>
        %28 = arith.mulf %27, %26 : vector<128x32xf32>
        %c0_18 = arith.constant 0 : index
        %c0_19 = arith.constant 0 : index
        %29 = vector.load %arg7[%c0_18, %c0_19] : memref<32x32xf32, #tpu.memory_space<vmem>>, vector<32x32xf32>
        %cst_20 = arith.constant dense<0.000000e+00> : vector<128x32xf32>
        %30 = tpu.matmul %28, %29, %cst_20 {dimension_numbers = #tpu.dot_dimension_numbers<[1], [0], [0], [1], [0, 0, 1, 1], [], []>} : vector<128x32xf32>, vector<32x32xf32>, vector<128x32xf32> -> vector<128x32xf32>
        %cst_21 = arith.constant 0.000000e+00 : f32
        %31 = vector.broadcast %cst_21 : f32 to vector<128x32xf32>
        %32 = arith.maximumf %30, %31 : vector<128x32xf32>
        %c0_22 = arith.constant 0 : index
        %c0_23 = arith.constant 0 : index
        %33 = vector.load %arg14[%c0_22, %c0_23] : memref<1x32xf32, #tpu.memory_space<vmem>>, vector<1x32xf32>
        %cst_24 = arith.constant dense<0.000000e+00> : vector<32xf32>
        %34 = vector.multi_reduction <add>, %32, %cst_24 [0] : vector<128x32xf32> to vector<32xf32>
        %35 = vector.shape_cast %34 : vector<32xf32> to vector<1x32xf32>
        %36 = arith.addf %33, %35 : vector<1x32xf32>
        %c0_25 = arith.constant 0 : index
        %c0_26 = arith.constant 0 : index
        %37 = vector.load %arg14[%c0_25, %c0_26] : memref<1x32xf32, #tpu.memory_space<vmem>>, vector<1x32xf32>
        tpu.vector_store %arg14[%c0_25, %c0_26], %36 {strides = array<i32>} : memref<1x32xf32, #tpu.memory_space<vmem>>, vector<1x32xf32>,
        %c0_i32_27 = arith.constant 0 : i32
        %38 = arith.cmpi eq, %arg1, %c0_i32_27 : i32
        %39 = arith.extui %38 : i1 to i32
        %c0_i32_28 = arith.constant 0 : i32
        %40 = arith.cmpi ne, %39, %c0_i32_28 : i32
        scf.if %40 {
          %c0_29 = arith.constant 0 : index
          %c0_30 = arith.constant 0 : index
          %41 = vector.load %arg14[%c0_29, %c0_30] : memref<1x32xf32, #tpu.memory_space<vmem>>, vector<1x32xf32>
          %c0_31 = arith.constant 0 : index
          %c0_32 = arith.constant 0 : index
          %42 = vector.load %arg8[%c0_31, %c0_32] : memref<32x128xf32, #tpu.memory_space<vmem>>, vector<32x128xf32>
          %cst_33 = arith.constant dense<0.000000e+00> : vector<1x128xf32>
          %43 = tpu.matmul %41, %42, %cst_33 {dimension_numbers = #tpu.dot_dimension_numbers<[1], [0], [0], [1], [0, 0, 1, 1], [], []>} : vector<1x32xf32>, vector<32x128xf32>, vector<1x128xf32> -> vector<1x128xf32>
          %c0_34 = arith.constant 0 : index
          %c0_35 = arith.constant 0 : index
          %44 = vector.load %arg9[%c0_34, %c0_35] : memref<1x128xf32, #tpu.memory_space<vmem>>, vector<1x128xf32>
          %45 = arith.addf %43, %44 : vector<1x128xf32>
          %c0_36 = arith.constant 0 : index
          %c0_37 = arith.constant 0 : index
          %46 = vector.load %arg10[%c0_36, %c0_37] : memref<1x128xf32, #tpu.memory_space<vmem>>, vector<1x128xf32>
          tpu.vector_store %arg10[%c0_36, %c0_37], %45 {strides = array<i32>} : memref<1x128xf32, #tpu.memory_space<vmem>>, vector<1x128xf32>,
        } else {
        }
      } else {
      }
    } else {
    }
    return
  }
  func.func @transform_0(%arg0: i32, %arg1: i32, %arg2: i32) -> (i32, i32) {
    %c0_i32 = arith.constant 0 : i32
    return %arg1, %arg2 : i32, i32
  }
  func.func @transform_1(%arg0: i32, %arg1: i32, %arg2: i32) -> (i32, i32) {
    %c0_i32 = arith.constant 0 : i32
    %c0_i32_0 = arith.constant 0 : i32
    return %arg2, %c0_i32 : i32, i32
  }
  func.func @transform_2(%arg0: i32, %arg1: i32, %arg2: i32) -> (i32, i32) {
    %c0_i32 = arith.constant 0 : i32
    %c0_i32_0 = arith.constant 0 : i32
    return %arg1, %c0_i32 : i32, i32
  }
  func.func @transform_3(%arg0: i32, %arg1: i32, %arg2: i32) -> (i32, i32) {
    %c0_i32 = arith.constant 0 : i32
    %c0_i32_0 = arith.constant 0 : i32
    %c0_i32_1 = arith.constant 0 : i32
    return %c0_i32, %c0_i32_0 : i32, i32
  }
  func.func @transform_4(%arg0: i32, %arg1: i32, %arg2: i32) -> (i32, i32) {
    %c0_i32 = arith.constant 0 : i32
    %c0_i32_0 = arith.constant 0 : i32
    %c0_i32_1 = arith.constant 0 : i32
    return %c0_i32, %c0_i32_0 : i32, i32
  }
  func.func @transform_5(%arg0: i32, %arg1: i32, %arg2: i32) -> (i32, i32) {
    %c0_i32 = arith.constant 0 : i32
    %c0_i32_0 = arith.constant 0 : i32
    %c0_i32_1 = arith.constant 0 : i32
    return %c0_i32, %c0_i32_0 : i32, i32
  }
  func.func @transform_6(%arg0: i32, %arg1: i32, %arg2: i32) -> (i32, i32) {
    %c0_i32 = arith.constant 0 : i32
    %c0_i32_0 = arith.constant 0 : i32
    %c0_i32_1 = arith.constant 0 : i32
    return %c0_i32, %c0_i32_0 : i32, i32
  }
  func.func @transform_7(%arg0: i32, %arg1: i32, %arg2: i32) -> (i32, i32) {
    %c0_i32 = arith.constant 0 : i32
    %c0_i32_0 = arith.constant 0 : i32
    %c0_i32_1 = arith.constant 0 : i32
    return %c0_i32, %c0_i32_0 : i32, i32
  }
}

</mosaic_0001>

<bundles_post_ra>
// kernel: tpu_custom_call.1
= control target key start
LH: loop header
LB: loop body
LE: loop exit
PB: predicated region body
PF: predicated region fallthrough
CT: control target
= control target key end

     0   :  { %12 = vsyncpa [#allocation7], 0  ;;  %s2338_s24 = smov 0   ;;  %s2340_s25 = smov 0   ;;  %s2877_s0 = inlined_call_operand.vmem [shape: s8[128,128], index: 0, kind: input, shape index: {}]   ;;  %s2878_s1 = inlined_call_operand.vmem [shape: f32[128,4], index: 1, kind: input, shape index: {}]   ;;  %s2879_s2 = inlined_call_operand.vmem [shape: f32[128,1], index: 2, kind: input, shape index: {}]   ;;  %s2880_s3 = inlined_call_operand.vmem [shape: f32[4,32], index: 3, kind: input, shape index: {}]   ;;  %s2881_s4 = inlined_call_operand.vmem [shape: f32[32,32], index: 4, kind: input, shape index: {}]   ;;  %s2882_s5 = inlined_call_operand.vmem [shape: f32[32,128], index: 5, kind: input, shape index: {}]   ;;  %s2883_s6 = inlined_call_operand.vmem [shape: f32[1,128], index: 6, kind: input, shape index: {}]   ;;  %s2884_s7 = inlined_call_operand.hbm [shape: f32[1,128], index: 7, kind: output, shape index: {}]  }
   0x1   :  { %s2342_s26 = smov 0  }
   0x2 LB: > { %s1785_s27 = sadd.s32 4294967295, %s2289_s26   ;;  %s37_s28 = sadd.s32 1, %s2285_s25  ;;  %s2289_s26 = sphi %s2342_s26, %s18_s26   ;;  %s2285_s25 = sphi %s2340_s25, %s2887_s25   ;;  %s2281_s24 = sphi %s2338_s24, %s2886_s24  }
   0x3   : > { %p39_p0 = scmp.ge.s32.totalorder %s37_s28, 2  ;;  %p1790_p1 = scmp.ge.s32.totalorder %s2289_s26, 1 }
   0x4   : > { %p280_p2 = scmp.lt.s32.totalorder %s2289_s26, 3 }
   0x5   : > { %s2889_s28 = smov (%p39_p0, %s37_s28), 0 }
   0x6   : > { %p281_p3 = pnand %p1790_p1, %p280_p2 }
   0x7   : > { %v341_v0 = vld [vmem:[%s2877_s0] sm:$0xff] (!%p281_p3)  ;;  %v342_v1 = vld [vmem:[%s2877_s0 + $0x8] sm:$0xff] (!%p281_p3)  ;;  %v343_v2 = vld [vmem:[%s2877_s0 + $0x10] sm:$0xff] (!%p281_p3)  ;;  %p1791_p4 = scmp.ne.s32.totalorder (!%p281_p3), %s2281_s24, 0 }
   0x8   : > { %284 = sbr.rel (%p281_p3) target bundleno = 1295 (0x50f), region = 48  ;;  %v344_v3 = vld [vmem:[%s2877_s0 + $0x18] sm:$0xff] (!%p281_p3)  ;;  %v345_v4 = vunpack.c.0.s8 (!%p281_p3), %v341_v0  ;;  %v346_v5 = vunpack.c.1.s8 (!%p281_p3), %v341_v0  ;;  %v347_v6 = vunpack.c.2.s8 (!%p281_p3), %v341_v0  ;;  %v348_v7 = vunpack.c.3.s8 (!%p281_p3), %v341_v0  ;;  %v2374_v8 = vld [vmem:[%s2879_s2] sm:$0xff] (!%p281_p3)  ;;  %v2379_v9 = vld [vmem:[%s2879_s2 + $0x8] sm:$0xff] (!%p281_p3) }
   0x9   : > { %v349_v10 = vunpack.c.0.s8 (!%p281_p3), %v342_v1  ;;  %v350_v11 = vunpack.c.1.s8 (!%p281_p3), %v342_v1  ;;  %v351_v12 = vunpack.c.2.s8 (!%p281_p3), %v342_v1  ;;  %v352_v13 = vunpack.c.3.s8 (!%p281_p3), %v342_v1  ;;  %v2384_v14 = vld [vmem:[%s2879_s2 + $0x10] sm:$0xff] (!%p281_p3)  ;;  %v2389_v15 = vld [vmem:[%s2879_s2 + $0x18] sm:$0xff] (!%p281_p3)  ;;  %v2394_v16 = vld [vmem:[%s2879_s2 + $0x20] sm:$0xff] (!%p281_p3) }
   0xa   : > { %v353_v17 = vunpack.c.0.s8 (!%p281_p3), %v343_v2  ;;  %v354_v18 = vunpack.c.1.s8 (!%p281_p3), %v343_v2  ;;  %v355_v19 = vunpack.c.2.s8 (!%p281_p3), %v343_v2  ;;  %v356_v20 = vunpack.c.3.s8 (!%p281_p3), %v343_v2  ;;  %v2399_v21 = vld [vmem:[%s2879_s2 + $0x28] sm:$0xff] (!%p281_p3)  ;;  %v2404_v22 = vld [vmem:[%s2879_s2 + $0x30] sm:$0xff] (!%p281_p3)  ;;  %v2409_v23 = vld [vmem:[%s2879_s2 + $0x38] sm:$0xff] (!%p281_p3) }
   0xb   : > { %v357_v24 = vunpack.c.0.s8 (!%p281_p3), %v344_v3  ;;  %v358_v25 = vunpack.c.1.s8 (!%p281_p3), %v344_v3  ;;  %v359_v26 = vunpack.c.2.s8 (!%p281_p3), %v344_v3  ;;  %v360_v27 = vunpack.c.3.s8 (!%p281_p3), %v344_v3  ;;  %v2414_v28 = vld [vmem:[%s2879_s2 + $0x40] sm:$0xff] (!%p281_p3)  ;;  %v2419_v29 = vld [vmem:[%s2879_s2 + $0x48] sm:$0xff] (!%p281_p3)  ;;  %v2424_v30 = vld [vmem:[%s2879_s2 + $0x50] sm:$0xff] (!%p281_p3) }
   0xc   : > { %v2426_v31 = vcvt.s32.f32 (!%p281_p3), %v345_v4  ;;  %v2428_v32 = vcvt.s32.f32 (!%p281_p3), %v346_v5  ;;  %v2430_v33 = vcvt.s32.f32 (!%p281_p3), %v347_v6  ;;  %v2432_v34 = vcvt.s32.f32 (!%p281_p3), %v348_v7  ;;  %v2437_v35 = vld [vmem:[%s2879_s2 + $0x58] sm:$0xff] (!%p281_p3)  ;;  %v2442_v36 = vld [vmem:[%s2879_s2 + $0x60] sm:$0xff] (!%p281_p3)  ;;  %v2447_v37 = vld [vmem:[%s2879_s2 + $0x68] sm:$0xff] (!%p281_p3) }
   0xd   : > { %v2449_v38 = vcvt.s32.f32 (!%p281_p3), %v349_v10  ;;  %v2451_v39 = vcvt.s32.f32 (!%p281_p3), %v350_v11  ;;  %v2453_v40 = vcvt.s32.f32 (!%p281_p3), %v351_v12  ;;  %v2455_v41 = vcvt.s32.f32 (!%p281_p3), %v352_v13  ;;  %v2460_v42 = vld [vmem:[%s2879_s2 + $0x70] sm:$0xff] (!%p281_p3)  ;;  %v2465_v43 = vld [vmem:[%s2879_s2 + $0x78] sm:$0xff] (!%p281_p3) }
   0xe   : > { %v2467_v44 = vcvt.s32.f32 (!%p281_p3), %v353_v17  ;;  %v2469_v45 = vcvt.s32.f32 (!%p281_p3), %v354_v18  ;;  %v2471_v46 = vcvt.s32.f32 (!%p281_p3), %v355_v19  ;;  %v2473_v47 = vcvt.s32.f32 (!%p281_p3), %v356_v20 }
   0xf   : > { %v2475_v48 = vcvt.s32.f32 %v357_v24  ;;  %v2477_v49 = vcvt.s32.f32 %v358_v25  ;;  %v2479_v50 = vcvt.s32.f32 %v359_v26  ;;  %v2481_v51 = vcvt.s32.f32 %v360_v27  ;;  %396 = sbr.rel (%p1791_p4) target bundleno = 523 (0x20b), region = 52  ;;  %v434_v52 = vld [vmem:[%s2878_s1] sm:$0xff] (!%p1791_p4)  ;;  %v435_v53 = vld [vmem:[%s2878_s1 + $0x8] sm:$0xff] (!%p1791_p4)  ;;  %v436_v54 = vld [vmem:[%s2878_s1 + $0x10] sm:$0xff] (!%p1791_p4)  ;;  %1969 = vmatprep.mubr.f32.mxu0 (!%p1791_p4), %v2426_v31 }
  0x10   : > { %v2118_v55 = vpack.c.bf16 (!%p1791_p4), %v435_v53, %v434_v52  ;;  %v437_v56 = vld [vmem:[%s2878_s1 + $0x18] sm:$0xff] (!%p1791_p4)  ;;  %v2291_v57 = vmov (!%p1791_p4), 0   ;;  %v438_v59 = vld [vmem:[%s2878_s1 + $0x20] sm:$0xff] (!%p1791_p4)  ;;  %v439_v60 = vld [vmem:[%s2878_s1 + $0x28] sm:$0xff] (!%p1791_p4)  ;;  %vm401_vm0 = vcmask (!%p1791_p4), 31744   ;;  %v2292_v17 = vmov (!%p1791_p4), 0.0  }
  0x11   : > { %2233 = vset.pattern.permute.xlu0 (!%p1791_p4), %v2291_v57  ;;  %2234 = vset.pattern.permute.xlu1 (!%p1791_p4), %v2291_v57  ;;  %v2122_v58 = vpack.c.bf16 (!%p1791_p4), %v437_v56, %v436_v54  ;;  %v2126_v61 = vpack.c.bf16 (!%p1791_p4), %v439_v60, %v438_v59  ;;  %v440_v62 = vld [vmem:[%s2878_s1 + $0x30] sm:$0xff] (!%p1791_p4)  ;;  %v441_v63 = vld [vmem:[%s2878_s1 + $0x38] sm:$0xff] (!%p1791_p4)  ;;  %v442_v1 = vld [vmem:[%s2878_s1 + $0x40] sm:$0xff] (!%p1791_p4)  ;;  %403 = vst.msk [vmem:[#allocation3 + $0x8] sm:$0xff] (!%p1791_p4), %vm401_vm0, %v2292_v17  ;;  %vm792_vm1 = vcmask (!%p1791_p4), 1043456   ;;  %vm975_vm2 = vcmask (!%p1791_p4), 261120  }
  0x12   : > { %649 = vperm.xlu0 (!%p1791_p4), %2233, %v2374_v8   ;;  %659 = vperm.xlu1 (!%p1791_p4), %2234, %v2384_v14   ;;  %v2130_v0 = vpack.c.bf16 (!%p1791_p4), %v441_v63, %v440_v62  ;;  %v443_v2 = vld [vmem:[%s2878_s1 + $0x48] sm:$0xff] (!%p1791_p4)  ;;  %v444_v4 = vld [vmem:[%s2878_s1 + $0x50] sm:$0xff] (!%p1791_p4)  ;;  %v445_v5 = vld [vmem:[%s2878_s1 + $0x58] sm:$0xff] (!%p1791_p4)  ;;  %402 = vst.msk [vmem:[#allocation3] sm:$0xff] (!%p1791_p4), %vm401_vm0, %v2292_v17 }
  0x13   : > { %2119 = vmatprep.subr.bf16.mxu0 (!%p1791_p4), %v2118_v55  ;;  %v2134_v3 = vpack.c.bf16 (!%p1791_p4), %v443_v2, %v442_v1  ;;  %v2138_v6 = vpack.c.bf16 (!%p1791_p4), %v445_v5, %v444_v4  ;;  %v446_v7 = vld [vmem:[%s2878_s1 + $0x60] sm:$0xff] (!%p1791_p4)  ;;  %v447_v10 = vld [vmem:[%s2878_s1 + $0x68] sm:$0xff] (!%p1791_p4)  ;;  %v448_v12 = vld [vmem:[%s2878_s1 + $0x70] sm:$0xff] (!%p1791_p4)  ;;  %404 = vst.msk [vmem:[#allocation3 + $0x10] sm:$0xff] (!%p1791_p4), %vm401_vm0, %v2292_v17 }
  0x14   : > { %2121 = vmatpush3.bf16.msra.mxu0 (!%p1791_p4), %v2118_v55  ;;  %v2142_v11 = vpack.c.bf16 (!%p1791_p4), %v447_v10, %v446_v7  ;;  %v449_v13 = vld [vmem:[%s2878_s1 + $0x78] sm:$0xff] (!%p1791_p4)  ;;  %405 = vst.msk [vmem:[#allocation3 + $0x18] sm:$0xff] (!%p1791_p4), %vm401_vm0, %v2292_v17  ;;  %406 = vst.msk [vmem:[#allocation3 + $0x20] sm:$0xff] (!%p1791_p4), %vm401_vm0, %v2292_v17  ;;  %v743_v19 = vld [vmem:[%s2880_s3] sm:$0xf] (!%p1791_p4) }
  0x15   : > { %2123 = vmatprep.subr.bf16.mxu0 (!%p1791_p4), %v2122_v58  ;;  %407 = vst.msk [vmem:[#allocation3 + $0x28] sm:$0xff] (!%p1791_p4), %vm401_vm0, %v2292_v17  ;;  %408 = vst.msk [vmem:[#allocation3 + $0x30] sm:$0xff] (!%p1791_p4), %vm401_vm0, %v2292_v17  ;;  %v2146_v18 = vpack.c.bf16 (!%p1791_p4), %v449_v13, %v448_v12  ;;  %1993 = vmatprep.subr.msk.mxu1 (!%p1791_p4), %vm792_vm1, %v743_v19 }
  0x16   : > { %654 = vperm.xlu0 %2233, %v2379_v9   ;;  %664 = vperm.xlu1 %2234, %v2389_v15   ;;  %409 = vst.msk [vmem:[#allocation3 + $0x38] sm:$0xff] %vm401_vm0, %v2292_v17  ;;  %410 = vst.msk [vmem:[#allocation3 + $0x40] sm:$0xff] %vm401_vm0, %v2292_v17 }
  0x17   : > { %411 = vst.msk [vmem:[#allocation3 + $0x48] sm:$0xff] %vm401_vm0, %v2292_v17  ;;  %412 = vst.msk [vmem:[#allocation3 + $0x50] sm:$0xff] %vm401_vm0, %v2292_v17  ;;  %1994 = vmatpush3.msk.msra.mxu1 %vm792_vm1, %v743_v19 }
  0x18   : > { %2125 = vmatpush3.bf16.msra.mxu0 %v2122_v58  ;;  %413 = vst.msk [vmem:[#allocation3 + $0x58] sm:$0xff] %vm401_vm0, %v2292_v17  ;;  %414 = vst.msk [vmem:[#allocation3 + $0x60] sm:$0xff] %vm401_vm0, %v2292_v17  ;;  %v419_v25 = vld [vmem:[#allocation3 + $0x8] sm:$0xff] }
  0x19   : > { %2127 = vmatprep.subr.bf16.mxu0 %v2126_v61  ;;  %415 = vst.msk [vmem:[#allocation3 + $0x68] sm:$0xff] %vm401_vm0, %v2292_v17  ;;  %416 = vst.msk [vmem:[#allocation3 + $0x70] sm:$0xff] %vm401_vm0, %v2292_v17  ;;  %v418_v26 = vld [vmem:[#allocation3] sm:$0xff] }
  0x1a   : > { %669 = vperm.xlu0 %2233, %v2394_v16   ;;  %674 = vperm.xlu1 %2234, %v2399_v21   ;;  %417 = vst.msk [vmem:[#allocation3 + $0x78] sm:$0xff] %vm401_vm0, %v2292_v17  ;;  %v420_v57 = vld [vmem:[#allocation3 + $0x10] sm:$0xff] }
  0x1b   : > { %v421_v55 = vld [vmem:[#allocation3 + $0x18] sm:$0xff] }
  0x1c   : > { %2129 = vmatpush3.bf16.msra.mxu0 %v2126_v61  ;;  %v423_v63 = vld [vmem:[#allocation3 + $0x28] sm:$0xff] }
  0x1d   : > { %2131 = vmatprep.subr.bf16.mxu0 %v2130_v0  ;;  %v425_v7 = vld [vmem:[#allocation3 + $0x38] sm:$0xff] }
  0x1e   : > { %679 = vperm.xlu0 %2233, %v2404_v22   ;;  %684 = vperm.xlu1 %2234, %v2409_v23  }
  0x20   : > { %2133 = vmatpush3.bf16.msra.mxu0 %v2130_v0  ;;  %v422_v0 = vld [vmem:[#allocation3 + $0x20] sm:$0xff] }
  0x21   : > { %2135 = vmatprep.subr.bf16.mxu0 %v2134_v3 }
  0x22   : > { %689 = vperm.xlu0 %2233, %v2414_v28   ;;  %694 = vperm.xlu1 %2234, %v2419_v29  }
  0x24   : > { %2137 = vmatpush3.bf16.msra.mxu0 %v2134_v3 }
  0x25   : > { %2139 = vmatprep.subr.bf16.mxu0 %v2138_v6 }
  0x26   : > { %699 = vperm.xlu0 %2233, %v2424_v30   ;;  %704 = vperm.xlu1 %2234, %v2437_v35  }
  0x28   : > { %2141 = vmatpush3.bf16.msra.mxu0 %v2138_v6 }
  0x29   : > { %2143 = vmatprep.subr.bf16.mxu0 %v2142_v11 }
  0x2a   : > { %709 = vperm.xlu0 %2233, %v2442_v36   ;;  %714 = vperm.xlu1 %2234, %v2447_v37  }
  0x2c   : > { %2145 = vmatpush3.bf16.msra.mxu0 %v2142_v11  ;;  %v424_v11 = vld [vmem:[#allocation3 + $0x30] sm:$0xff] }
  0x2d   : > { %2147 = vmatprep.subr.bf16.mxu0 %v2146_v18 }
  0x2e   : > { %719 = vperm.xlu0 %2233, %v2460_v42   ;;  %724 = vperm.xlu1 %2234, %v2465_v43  }
  0x30   : > { %2149 = vmatpush3.bf16.msra.mxu0 %v2146_v18 }
  0x33   : > { %1970 = vmatmul.mubr.f32.vlgmr.msra.gmra.mrb[0].mxu0 %v2428_v32 }
  0x34   : > { %1972 = vmatprep.mubr.f32.mxu0 %v2430_v33 }
  0x37   : > { %1973 = vmatmul.mubr.f32.gmra.mrb[2].mxu0 %v2432_v34 }
  0x38   : > { %1975 = vmatprep.mubr.f32.mxu0 %v2449_v38 }
  0x3b   : > { %1976 = vmatmul.mubr.f32.gmra.mrb[4].mxu0 %v2451_v39 }
  0x3c   : > { %1978 = vmatprep.mubr.f32.mxu0 %v2453_v40 }
  0x3f   : > { %1979 = vmatmul.mubr.f32.gmra.mrb[6].mxu0 %v2455_v41 }
  0x40   : > { %1981 = vmatprep.mubr.f32.mxu0 %v2467_v44 }
  0x43   : > { %1982 = vmatmul.mubr.f32.gmra.mrb[8].mxu0 %v2469_v45 }
  0x44   : > { %1984 = vmatprep.mubr.f32.mxu0 %v2471_v46 }
  0x47   : > { %1985 = vmatmul.mubr.f32.gmra.mrb[10].mxu0 %v2473_v47 }
  0x48   : > { %1987 = vmatprep.mubr.f32.mxu0 %v2475_v48 }
  0x4b   : > { %1988 = vmatmul.mubr.f32.gmra.mrb[12].mxu0 %v2477_v49 }
  0x4c   : > { %1990 = vmatprep.mubr.f32.mxu0 %v2479_v50 }
  0x4f   : > { %1991 = vmatmul.mubr.f32.gmra.mrb[14].mxu0 %v2481_v51 }
  0x91   : > { %v2583_v20 = vpop.permute.xlu0 %649  ;;  %v2585_v24 = vpop.permute.xlu1 %659 }
  0x95   : > { %v2587_v56 = vpop.permute.xlu0 %654  ;;  %v2590_v58 = vpop.permute.xlu1 %664 }
  0x99   : > { %v2595_v2 = vpop.permute.xlu0 %669  ;;  %v2597_v5 = vpop.permute.xlu1 %674 }
 0x106   : > { %v1971_v27 = vpop.f32.mrb[0].mxu0 }
 0x107   : > { %v596_v52 = vadd.f32 %v1971_v27, %v419_v25  ;;  %v516_v53 = vpop.f32.mrb[1].mxu0  ;;  %v427_v27 = vld [vmem:[#allocation3 + $0x48] sm:$0xff] }
 0x108   : > { %v595_v54 = vadd.f32 %v516_v53, %v418_v26  ;;  %v2604_v53 = vpop.permute.xlu0 %679 }
 0x109   : > { %613 = vst.msk [vmem:[#allocation3 + $0x8] sm:$0xff] %vm401_vm0, %v596_v52 }
 0x10a   : > { %612 = vst.msk [vmem:[#allocation3] sm:$0xff] %vm401_vm0, %v595_v54  ;;  %v1974_v59 = vpop.f32.mrb[2].mxu0  ;;  %v426_v54 = vld [vmem:[#allocation3 + $0x40] sm:$0xff] }
 0x10b   : > { %v598_v60 = vadd.f32 %v1974_v59, %v421_v55  ;;  %v526_v61 = vpop.f32.mrb[3].mxu0 }
 0x10c   : > { %v597_v62 = vadd.f32 %v526_v61, %v420_v57  ;;  %v2608_v57 = vpop.permute.xlu1 %684 }
 0x10d   : > { %615 = vst.msk [vmem:[#allocation3 + $0x18] sm:$0xff] %vm401_vm0, %v598_v60 }
 0x10e   : > { %614 = vst.msk [vmem:[#allocation3 + $0x10] sm:$0xff] %vm401_vm0, %v597_v62  ;;  %v1977_v1 = vpop.f32.mrb[4].mxu0 }
 0x10f   : > { %v600_v3 = vadd.f32 %v1977_v1, %v423_v63  ;;  %v536_v4 = vpop.f32.mrb[5].mxu0  ;;  %v429_v1 = vld [vmem:[#allocation3 + $0x58] sm:$0xff] }
 0x110   : > { %v599_v6 = vadd.f32 %v536_v4, %v422_v0  ;;  %v632_v10 = vld [vmem:[#allocation3 + $0x8] sm:$0xff]  ;;  %v428_v4 = vld [vmem:[#allocation3 + $0x50] sm:$0xff] }
 0x111   : > { %617 = vst.msk [vmem:[#allocation3 + $0x28] sm:$0xff] %vm401_vm0, %v600_v3  ;;  %v631_v12 = vld [vmem:[#allocation3] sm:$0xff]  ;;  %v728_v25 = vmul.f32 %v2587_v56, %v632_v10 }
 0x112   : > { %616 = vst.msk [vmem:[#allocation3 + $0x20] sm:$0xff] %vm401_vm0, %v599_v6  ;;  %v1980_v13 = vpop.f32.mrb[6].mxu0  ;;  %v727_v17 = vmul.f32 %v2583_v20, %v631_v12 }
 0x113   : > { %v602_v18 = vadd.f32 %v1980_v13, %v425_v7  ;;  %v546_v19 = vpop.f32.mrb[7].mxu0 }
 0x114   : > { %v601_v26 = vadd.f32 %v546_v19, %v424_v11  ;;  %1995 = vmatprep.mubr.msk.f32.mxu1 %vm401_vm0, %v727_v17  ;;  %v634_v52 = vld [vmem:[#allocation3 + $0x18] sm:$0xff]  ;;  %v2618_v11 = vpop.permute.xlu0 %689 }
 0x115   : > { %619 = vst.msk [vmem:[#allocation3 + $0x38] sm:$0xff] %vm401_vm0, %v602_v18  ;;  %1996 = vmatmul.mubr.msk.f32.vlgmr.msra.gmra.mrb[0].mxu1 %vm401_vm0, %v728_v25  ;;  %v633_v55 = vld [vmem:[#allocation3 + $0x10] sm:$0xff]  ;;  %v730_v63 = vmul.f32 %v2590_v58, %v634_v52  ;;  %v2621_v18 = vpop.permute.xlu1 %694  ;;  %v431_v25 = vld [vmem:[#allocation3 + $0x68] sm:$0xff] }
 0x116   : > { %618 = vst.msk [vmem:[#allocation3 + $0x30] sm:$0xff] %vm401_vm0, %v601_v26  ;;  %v1983_v59 = vpop.f32.mrb[8].mxu0  ;;  %v729_v60 = vmul.f32 %v2585_v24, %v633_v55 }
 0x117   : > { %v604_v61 = vadd.f32 %v1983_v59, %v427_v27  ;;  %v556_v62 = vpop.f32.mrb[9].mxu0  ;;  %v430_v27 = vld [vmem:[#allocation3 + $0x60] sm:$0xff] }
 0x118   : > { %v603_v0 = vadd.f32 %v556_v62, %v426_v54  ;;  %1998 = vmatprep.mubr.msk.f32.mxu1 %vm401_vm0, %v729_v60  ;;  %v636_v3 = vld [vmem:[#allocation3 + $0x28] sm:$0xff] }
 0x119   : > { %621 = vst.msk [vmem:[#allocation3 + $0x48] sm:$0xff] %vm401_vm0, %v604_v61  ;;  %1999 = vmatmul.mubr.msk.f32.gmra.mrb[2].mxu1 %vm401_vm0, %v730_v63  ;;  %v635_v6 = vld [vmem:[#allocation3 + $0x20] sm:$0xff]  ;;  %v732_v17 = vmul.f32 %v2597_v5, %v636_v3  ;;  %v433_v63 = vld [vmem:[#allocation3 + $0x78] sm:$0xff]  ;;  %v432_v3 = vld [vmem:[#allocation3 + $0x70] sm:$0xff] }
 0x11a   : > { %620 = vst.msk [vmem:[#allocation3 + $0x40] sm:$0xff] %vm401_vm0, %v603_v0  ;;  %v1986_v7 = vpop.f32.mrb[10].mxu0  ;;  %v731_v10 = vmul.f32 %v2595_v2, %v635_v6  ;;  %v2634_v6 = vpop.permute.xlu1 %704 }
 0x11b   : > { %v606_v12 = vadd.f32 %v1986_v7, %v429_v1  ;;  %v566_v13 = vpop.f32.mrb[11].mxu0  ;;  %v2630_v1 = vpop.permute.xlu0 %699 }
 0x11c   : > { %v605_v19 = vadd.f32 %v566_v13, %v428_v4  ;;  %2001 = vmatprep.mubr.msk.f32.mxu1 %vm401_vm0, %v731_v10  ;;  %v638_v26 = vld [vmem:[#allocation3 + $0x38] sm:$0xff] }
 0x11d   : > { %623 = vst.msk [vmem:[#allocation3 + $0x58] sm:$0xff] %vm401_vm0, %v606_v12  ;;  %2002 = vmatmul.mubr.msk.f32.gmra.mrb[4].mxu1 %vm401_vm0, %v732_v17  ;;  %v637_v52 = vld [vmem:[#allocation3 + $0x30] sm:$0xff]  ;;  %v734_v61 = vmul.f32 %v2608_v57, %v638_v26 }
 0x11e   : > { %622 = vst.msk [vmem:[#allocation3 + $0x50] sm:$0xff] %vm401_vm0, %v605_v19  ;;  %v1989_v54 = vpop.f32.mrb[12].mxu0  ;;  %v733_v55 = vmul.f32 %v2604_v53, %v637_v52 }
 0x11f   : > { %v608_v59 = vadd.f32 %v1989_v54, %v431_v25  ;;  %v576_v60 = vpop.f32.mrb[13].mxu0  ;;  %v2644_v52 = vpop.permute.xlu0 %709 }
 0x120   : > { %v607_v62 = vadd.f32 %v576_v60, %v430_v27  ;;  %2004 = vmatprep.mubr.msk.f32.mxu1 %vm401_vm0, %v733_v55  ;;  %v640_v0 = vld [vmem:[#allocation3 + $0x48] sm:$0xff]  ;;  %v2647_v55 = vpop.permute.xlu1 %714 }
 0x121   : > { %625 = vst.msk [vmem:[#allocation3 + $0x68] sm:$0xff] %vm401_vm0, %v608_v59  ;;  %2005 = vmatmul.mubr.msk.f32.gmra.mrb[6].mxu1 %vm401_vm0, %v734_v61  ;;  %v639_v4 = vld [vmem:[#allocation3 + $0x40] sm:$0xff]  ;;  %v736_v17 = vmul.f32 %v2621_v18, %v640_v0 }
 0x122   : > { %624 = vst.msk [vmem:[#allocation3 + $0x60] sm:$0xff] %vm401_vm0, %v607_v62  ;;  %v1992_v7 = vpop.f32.mrb[14].mxu0  ;;  %v735_v10 = vmul.f32 %v2618_v11, %v639_v4 }
 0x123   : > { %v610_v12 = vadd.f32 %v1992_v7, %v433_v63  ;;  %v586_v13 = vpop.f32.mrb[15].mxu0  ;;  %v2654_v0 = vpop.permute.xlu0 %719 }
 0x124   : > { %v609_v19 = vadd.f32 %v586_v13, %v432_v3  ;;  %2007 = vmatprep.mubr.msk.f32.mxu1 %vm401_vm0, %v735_v10  ;;  %v642_v25 = vld [vmem:[#allocation3 + $0x58] sm:$0xff]  ;;  %v2657_v4 = vpop.permute.xlu1 %724 }
 0x125   : > { %627 = vst.msk [vmem:[#allocation3 + $0x78] sm:$0xff] %vm401_vm0, %v610_v12  ;;  %2008 = vmatmul.mubr.msk.f32.gmra.mrb[8].mxu1 %vm401_vm0, %v736_v17  ;;  %v641_v26 = vld [vmem:[#allocation3 + $0x50] sm:$0xff]  ;;  %v738_v54 = vmul.f32 %v2634_v6, %v642_v25 }
 0x126   : > { %626 = vst.msk [vmem:[#allocation3 + $0x70] sm:$0xff] %vm401_vm0, %v609_v19  ;;  %v737_v27 = vmul.f32 %v2630_v1, %v641_v26 }
 0x128   : > { %2010 = vmatprep.mubr.msk.f32.mxu1 %vm401_vm0, %v737_v27  ;;  %v644_v59 = vld [vmem:[#allocation3 + $0x68] sm:$0xff] }
 0x129   : > { %2011 = vmatmul.mubr.msk.f32.gmra.mrb[10].mxu1 %vm401_vm0, %v738_v54  ;;  %v643_v60 = vld [vmem:[#allocation3 + $0x60] sm:$0xff]  ;;  %v740_v62 = vmul.f32 %v2647_v55, %v644_v59 }
 0x12a   : > { %v739_v61 = vmul.f32 %v2644_v52, %v643_v60 }
 0x12c   : > { %2013 = vmatprep.mubr.msk.f32.mxu1 %vm401_vm0, %v739_v61  ;;  %v646_v63 = vld [vmem:[#allocation3 + $0x78] sm:$0xff] }
 0x12d   : > { %2014 = vmatmul.mubr.msk.f32.gmra.mrb[12].mxu1 %vm401_vm0, %v740_v62  ;;  %v645_v3 = vld [vmem:[#allocation3 + $0x70] sm:$0xff]  ;;  %v742_v10 = vmul.f32 %v2657_v4, %v646_v63 }
 0x12e   : > { %v741_v7 = vmul.f32 %v2654_v0, %v645_v3 }
 0x130   : > { %2016 = vmatprep.mubr.msk.f32.mxu1 %vm401_vm0, %v741_v7 }
 0x131   : > { %2017 = vmatmul.mubr.msk.f32.gmra.mrb[14].mxu1 %vm401_vm0, %v742_v10 }
 0x1e8   : > { %v1997_v12 = vpop.f32.mrb[0].mxu1 }
 0x1e9   : > { %v942_v13 = vmax.f32 %v1997_v12, 0.0  ;;  %v862_v17 = vpop.f32.mrb[1].mxu1 }
 0x1ea   : > { %v941_v19 = vmax.f32 %v862_v17, 0.0 }
 0x1eb   : > { %v959_v25 = vmul.f32 %v942_v13, %v2587_v56 }
 0x1ec   : > { %v958_v26 = vmul.f32 %v941_v19, %v2583_v20  ;;  %v2000_v27 = vpop.f32.mrb[2].mxu1 }
 0x1ed   : > { %977 = vst.msk [vmem:[#allocation2 + $0x8] sm:$0xff] %vm975_vm2, %v959_v25  ;;  %v944_v54 = vmax.f32 %v2000_v27, 0.0  ;;  %v872_v59 = vpop.f32.mrb[3].mxu1 }
 0x1ee   : > { %976 = vst.msk [vmem:[#allocation2] sm:$0xff] %vm975_vm2, %v958_v26  ;;  %v943_v60 = vmax.f32 %v872_v59, 0.0 }
 0x1ef   : > { %v961_v61 = vmul.f32 %v944_v54, %v2590_v58 }
 0x1f0   : > { %v960_v62 = vmul.f32 %v943_v60, %v2585_v24  ;;  %v2003_v63 = vpop.f32.mrb[4].mxu1 }
 0x1f1   : > { %979 = vst.msk [vmem:[#allocation2 + $0x18] sm:$0xff] %vm975_vm2, %v961_v61  ;;  %v946_v3 = vmax.f32 %v2003_v63, 0.0  ;;  %v882_v7 = vpop.f32.mrb[5].mxu1 }
 0x1f2   : > { %978 = vst.msk [vmem:[#allocation2 + $0x10] sm:$0xff] %vm975_vm2, %v960_v62  ;;  %v945_v20 = vmax.f32 %v882_v7, 0.0 }
 0x1f3   : > { %v963_v56 = vmul.f32 %v946_v3, %v2597_v5 }
 0x1f4   : > { %v962_v10 = vmul.f32 %v945_v20, %v2595_v2  ;;  %v2006_v12 = vpop.f32.mrb[6].mxu1 }
 0x1f5   : > { %981 = vst.msk [vmem:[#allocation2 + $0x28] sm:$0xff] %vm975_vm2, %v963_v56  ;;  %v948_v13 = vmax.f32 %v2006_v12, 0.0  ;;  %v892_v17 = vpop.f32.mrb[7].mxu1 }
 0x1f6   : > { %980 = vst.msk [vmem:[#allocation2 + $0x20] sm:$0xff] %vm975_vm2, %v962_v10  ;;  %v947_v24 = vmax.f32 %v892_v17, 0.0 }
 0x1f7   : > { %v965_v58 = vmul.f32 %v948_v13, %v2608_v57 }
 0x1f8   : > { %v964_v19 = vmul.f32 %v947_v24, %v2604_v53  ;;  %v2009_v25 = vpop.f32.mrb[8].mxu1 }
 0x1f9   : > { %983 = vst.msk [vmem:[#allocation2 + $0x38] sm:$0xff] %vm975_vm2, %v965_v58  ;;  %v950_v26 = vmax.f32 %v2009_v25, 0.0  ;;  %v902_v27 = vpop.f32.mrb[9].mxu1 }
 0x1fa   : > { %982 = vst.msk [vmem:[#allocation2 + $0x30] sm:$0xff] %vm975_vm2, %v964_v19  ;;  %v949_v2 = vmax.f32 %v902_v27, 0.0 }
 0x1fb   : > { %v967_v5 = vmul.f32 %v950_v26, %v2621_v18 }
 0x1fc   : > { %v966_v54 = vmul.f32 %v949_v2, %v2618_v11  ;;  %v2012_v59 = vpop.f32.mrb[10].mxu1 }
 0x1fd   : > { %985 = vst.msk [vmem:[#allocation2 + $0x48] sm:$0xff] %vm975_vm2, %v967_v5  ;;  %v952_v60 = vmax.f32 %v2012_v59, 0.0  ;;  %v912_v61 = vpop.f32.mrb[11].mxu1 }
 0x1fe   : > { %984 = vst.msk [vmem:[#allocation2 + $0x40] sm:$0xff] %vm975_vm2, %v966_v54  ;;  %v951_v53 = vmax.f32 %v912_v61, 0.0 }
 0x1ff   : > { %v969_v57 = vmul.f32 %v952_v60, %v2634_v6 }
 0x200   : > { %v968_v62 = vmul.f32 %v951_v53, %v2630_v1  ;;  %v2015_v63 = vpop.f32.mrb[12].mxu1 }
 0x201   : > { %987 = vst.msk [vmem:[#allocation2 + $0x58] sm:$0xff] %vm975_vm2, %v969_v57  ;;  %v954_v3 = vmax.f32 %v2015_v63, 0.0  ;;  %v922_v7 = vpop.f32.mrb[13].mxu1 }
 0x202   : > { %986 = vst.msk [vmem:[#allocation2 + $0x50] sm:$0xff] %vm975_vm2, %v968_v62  ;;  %v953_v11 = vmax.f32 %v922_v7, 0.0 }
 0x203   : > { %v971_v18 = vmul.f32 %v954_v3, %v2647_v55 }
 0x204   : > { %v970_v20 = vmul.f32 %v953_v11, %v2644_v52  ;;  %v2018_v56 = vpop.f32.mrb[14].mxu1 }
 0x205   : > { %989 = vst.msk [vmem:[#allocation2 + $0x68] sm:$0xff] %vm975_vm2, %v971_v18  ;;  %v956_v10 = vmax.f32 %v2018_v56, 0.0  ;;  %v932_v12 = vpop.f32.mrb[15].mxu1 }
 0x206   : > { %988 = vst.msk [vmem:[#allocation2 + $0x60] sm:$0xff] %vm975_vm2, %v970_v20  ;;  %v955_v1 = vmax.f32 %v932_v12, 0.0 }
 0x207   : > { %v973_v6 = vmul.f32 %v956_v10, %v2657_v4 }
 0x208   : > { %v972_v13 = vmul.f32 %v955_v1, %v2654_v0 }
 0x209   : > { %991 = vst.msk [vmem:[#allocation2 + $0x78] sm:$0xff] %vm975_vm2, %v973_v6 }
 0x20a   : > { %990 = vst.msk [vmem:[#allocation2 + $0x70] sm:$0xff] %vm975_vm2, %v972_v13 }
 0x20b PF: > { %p1809_p5 = scmp.ne.s32.totalorder %s2281_s24, 1 }
 0x20c   : > { %v1035_v52 = vld [vmem:[#allocation2] sm:$0xff] (!%p1809_p5)  ;;  %v1036_v55 = vld [vmem:[#allocation2 + $0x8] sm:$0xff] (!%p1809_p5)  ;;  %v1037_v17 = vld [vmem:[#allocation2 + $0x10] sm:$0xff] (!%p1809_p5)  ;;  %2051 = vmatprep.mubr.f32.mxu0 (!%p1809_p5), %v2426_v31  ;;  %v2293_v19 = vmov (!%p1809_p5), 0   ;;  %vm1000_vm3 = vcmask (!%p1809_p5), 261120   ;;  %vm1236_vm4 = vcmask (!%p1809_p5), 253952  }
 0x20d   : > { %995 = sbr.rel (%p1809_p5) target bundleno = 1270 (0x4f6), region = 64  ;;  %v2150_v24 = vpack.c.bf16 (!%p1809_p5), %v1036_v55, %v1035_v52  ;;  %v1038_v58 = vld [vmem:[#allocation2 + $0x18] sm:$0xff] (!%p1809_p5)  ;;  %2235 = vset.pattern.permute.xlu0 (!%p1809_p5), %v2293_v19  ;;  %2236 = vset.pattern.permute.xlu1 (!%p1809_p5), %v2293_v19  ;;  %v1039_v0 = vld [vmem:[#allocation2 + $0x20] sm:$0xff] (!%p1809_p5)  ;;  %v1040_v25 = vld [vmem:[#allocation2 + $0x28] sm:$0xff] (!%p1809_p5)  ;;  %vm2296_vm5 = vmmov (!%p1809_p5), 0  }
 0x20e   : > { %v2154_v4 = vpack.c.bf16 (!%p1809_p5), %v1038_v58, %v1037_v17  ;;  %1256 = vperm.xlu0 (!%p1809_p5), %2235, %v2374_v8   ;;  %1266 = vperm.xlu1 (!%p1809_p5), %2236, %v2384_v14   ;;  %v2158_v26 = vpack.c.bf16 (!%p1809_p5), %v1040_v25, %v1039_v0  ;;  %v1041_v27 = vld [vmem:[#allocation2 + $0x30] sm:$0xff] (!%p1809_p5)  ;;  %v1042_v2 = vld [vmem:[#allocation2 + $0x38] sm:$0xff] (!%p1809_p5)  ;;  %v1043_v5 = vld [vmem:[#allocation2 + $0x40] sm:$0xff] (!%p1809_p5) }
 0x20f   : > { %2151 = vmatprep.subr.bf16.mxu0 (!%p1809_p5), %v2150_v24  ;;  %v2162_v31 = vpack.c.bf16 (!%p1809_p5), %v1042_v2, %v1041_v27  ;;  %v1044_v54 = vld [vmem:[#allocation2 + $0x48] sm:$0xff] (!%p1809_p5)  ;;  %v1045_v14 = vld [vmem:[#allocation2 + $0x50] sm:$0xff] (!%p1809_p5)  ;;  %v1046_v59 = vld [vmem:[#allocation2 + $0x58] sm:$0xff] (!%p1809_p5) }
 0x210   : > { %2153 = vmatpush3.bf16.msra.mxu0 (!%p1809_p5), %v2150_v24  ;;  %v2166_v8 = vpack.c.bf16 (!%p1809_p5), %v1044_v54, %v1043_v5  ;;  %v1048_v60 = vld [vmem:[#allocation2 + $0x68] sm:$0xff] (!%p1809_p5)  ;;  %v1050_v61 = vld [vmem:[#allocation2 + $0x78] sm:$0xff] (!%p1809_p5) }
 0x211   : > { %2155 = vmatprep.subr.bf16.mxu0 (!%p1809_p5), %v2154_v4 }
 0x212   : > { %1261 = vperm.xlu0 (!%p1809_p5), %2235, %v2379_v9   ;;  %1271 = vperm.xlu1 (!%p1809_p5), %2236, %v2389_v15   ;;  %v2170_v9 = vpack.c.bf16 (!%p1809_p5), %v1046_v59, %v1045_v14  ;;  %v1047_v15 = vld [vmem:[#allocation2 + $0x60] sm:$0xff] (!%p1809_p5) }
 0x214   : > { %2157 = vmatpush3.bf16.msra.mxu0 %v2154_v4 }
 0x215   : > { %2159 = vmatprep.subr.bf16.mxu0 %v2158_v26 }
 0x216   : > { %1276 = vperm.xlu0 %2235, %v2394_v16   ;;  %1281 = vperm.xlu1 %2236, %v2399_v21   ;;  %v2174_v16 = vpack.c.bf16 %v1048_v60, %v1047_v15  ;;  %v1049_v21 = vld [vmem:[#allocation2 + $0x70] sm:$0xff] }
 0x218   : > { %2161 = vmatpush3.bf16.msra.mxu0 %v2158_v26 }
 0x219   : > { %2163 = vmatprep.subr.bf16.mxu0 %v2162_v31 }
 0x21a   : > { %1286 = vperm.xlu0 %2235, %v2404_v22   ;;  %1291 = vperm.xlu1 %2236, %v2409_v23   ;;  %v2294_v22 = vmov 0.0   ;;  %v2178_v23 = vpack.c.bf16 %v1050_v61, %v1049_v21 }
 0x21b   : > { %1002 = vst.msk [vmem:[#allocation4 + $0x8] sm:$0xff] %vm1000_vm3, %v2294_v22  ;;  %1001 = vst.msk [vmem:[#allocation4] sm:$0xff] %vm1000_vm3, %v2294_v22 }
 0x21c   : > { %2165 = vmatpush3.bf16.msra.mxu0 %v2162_v31  ;;  %1003 = vst.msk [vmem:[#allocation4 + $0x10] sm:$0xff] %vm1000_vm3, %v2294_v22  ;;  %1004 = vst.msk [vmem:[#allocation4 + $0x18] sm:$0xff] %vm1000_vm3, %v2294_v22 }
 0x21d   : > { %2167 = vmatprep.subr.bf16.mxu0 %v2166_v8  ;;  %1005 = vst.msk [vmem:[#allocation4 + $0x20] sm:$0xff] %vm1000_vm3, %v2294_v22  ;;  %1006 = vst.msk [vmem:[#allocation4 + $0x28] sm:$0xff] %vm1000_vm3, %v2294_v22 }
 0x21e   : > { %1296 = vperm.xlu0 %2235, %v2414_v28   ;;  %1301 = vperm.xlu1 %2236, %v2419_v29   ;;  %1007 = vst.msk [vmem:[#allocation4 + $0x30] sm:$0xff] %vm1000_vm3, %v2294_v22  ;;  %1008 = vst.msk [vmem:[#allocation4 + $0x38] sm:$0xff] %vm1000_vm3, %v2294_v22  ;;  %v1350_v28 = vld [vmem:[%s2881_s4] sm:$0xff]  ;;  %v1351_v29 = vld [vmem:[%s2881_s4 + $0x8] sm:$0xff] }
 0x21f   : > { %1009 = vst.msk [vmem:[#allocation4 + $0x40] sm:$0xff] %vm1000_vm3, %v2294_v22  ;;  %1010 = vst.msk [vmem:[#allocation4 + $0x48] sm:$0xff] %vm1000_vm3, %v2294_v22 }
 0x220   : > { %2169 = vmatpush3.bf16.msra.mxu0 %v2166_v8  ;;  %1011 = vst.msk [vmem:[#allocation4 + $0x50] sm:$0xff] %vm1000_vm3, %v2294_v22  ;;  %1012 = vst.msk [vmem:[#allocation4 + $0x58] sm:$0xff] %vm1000_vm3, %v2294_v22 }
 0x221   : > { %2171 = vmatprep.subr.bf16.mxu0 %v2170_v9  ;;  %1013 = vst.msk [vmem:[#allocation4 + $0x60] sm:$0xff] %vm1000_vm3, %v2294_v22  ;;  %1014 = vst.msk [vmem:[#allocation4 + $0x68] sm:$0xff] %vm1000_vm3, %v2294_v22 }
 0x222   : > { %1306 = vperm.xlu0 %2235, %v2424_v30   ;;  %1311 = vperm.xlu1 %2236, %v2437_v35   ;;  %1015 = vst.msk [vmem:[#allocation4 + $0x70] sm:$0xff] %vm1000_vm3, %v2294_v22  ;;  %1016 = vst.msk [vmem:[#allocation4 + $0x78] sm:$0xff] %vm1000_vm3, %v2294_v22  ;;  %v2182_v30 = vpack.c.bf16 %v1351_v29, %v1350_v28 }
 0x223   : > { %1237 = vst.msk [vmem:[#allocation5] sm:$0x1] %vm1236_vm4, %v2294_v22 }
 0x224   : > { %2173 = vmatpush3.bf16.msra.mxu0 %v2170_v9  ;;  %2183 = vmatprep.subr.bf16.mxu1 %v2182_v30  ;;  %v1022_v53 = vld [vmem:[#allocation4 + $0x20] sm:$0xff] }
 0x225   : > { %2175 = vmatprep.subr.bf16.mxu0 %v2174_v16  ;;  %2185 = vmatpush3.bf16.msra.mxu1 %v2182_v30  ;;  %v1025_v18 = vld [vmem:[#allocation4 + $0x38] sm:$0xff]  ;;  %v1024_v56 = vld [vmem:[#allocation4 + $0x30] sm:$0xff] }
 0x226   : > { %1316 = vperm.xlu0 %2235, %v2442_v36   ;;  %1321 = vperm.xlu1 %2236, %v2447_v37   ;;  %v1019_v37 = vld [vmem:[#allocation4 + $0x8] sm:$0xff]  ;;  %v1026_v19 = vld [vmem:[#allocation4 + $0x40] sm:$0xff] }
 0x227   : > { %v1027_v17 = vld [vmem:[#allocation4 + $0x48] sm:$0xff]  ;;  %v1029_v54 = vld [vmem:[#allocation4 + $0x58] sm:$0xff]  ;;  %v1028_v14 = vld [vmem:[#allocation4 + $0x50] sm:$0xff] }
 0x228   : > { %2177 = vmatpush3.bf16.msra.mxu0 %v2174_v16  ;;  %v1031_v29 = vld [vmem:[#allocation4 + $0x68] sm:$0xff] }
 0x229   : > { %2179 = vmatprep.subr.bf16.mxu0 %v2178_v23 }
 0x22a   : > { %1326 = vperm.xlu0 %2235, %v2460_v42   ;;  %1331 = vperm.xlu1 %2236, %v2465_v43   ;;  %v1021_v43 = vld [vmem:[#allocation4 + $0x18] sm:$0xff] }
 0x22c   : > { %2181 = vmatpush3.bf16.msra.mxu0 %v2178_v23 }
 0x22f   : > { %2052 = vmatmul.mubr.f32.vlgmr.msra.gmra.mrb[0].mxu0 %v2428_v32  ;;  %v1352_v32 = vld [vmem:[%s2881_s4 + $0x10] sm:$0xff] }
 0x230   : > { %2054 = vmatprep.mubr.f32.mxu0 %v2430_v33  ;;  %v1353_v33 = vld [vmem:[%s2881_s4 + $0x18] sm:$0xff] }
 0x233   : > { %2055 = vmatmul.mubr.f32.gmra.mrb[2].mxu0 %v2432_v34  ;;  %v2186_v34 = vpack.c.bf16 %v1353_v33, %v1352_v32  ;;  %v1030_v32 = vld [vmem:[#allocation4 + $0x60] sm:$0xff] }
 0x234   : > { %2057 = vmatprep.mubr.f32.mxu0 %v2449_v38  ;;  %v1018_v38 = vld [vmem:[#allocation4] sm:$0xff] }
 0x235   : > { %2187 = vmatprep.subr.bf16.mxu1 %v2186_v34 }
 0x236   : > { %2189 = vmatpush3.bf16.msra.mxu1 %v2186_v34 }
 0x237   : > { %2058 = vmatmul.mubr.f32.gmra.mrb[4].mxu0 %v2451_v39 }
 0x238   : > { %2060 = vmatprep.mubr.f32.mxu0 %v2453_v40 }
 0x23b   : > { %2061 = vmatmul.mubr.f32.gmra.mrb[6].mxu0 %v2455_v41 }
 0x23c   : > { %2063 = vmatprep.mubr.f32.mxu0 %v2467_v44 }
 0x23f   : > { %2064 = vmatmul.mubr.f32.gmra.mrb[8].mxu0 %v2469_v45  ;;  %v1020_v45 = vld [vmem:[#allocation4 + $0x10] sm:$0xff] }
 0x240   : > { %2066 = vmatprep.mubr.f32.mxu0 %v2471_v46 }
 0x243   : > { %2067 = vmatmul.mubr.f32.gmra.mrb[10].mxu0 %v2473_v47 }
 0x244   : > { %2069 = vmatprep.mubr.f32.mxu0 %v2475_v48 }
 0x247   : > { %2070 = vmatmul.mubr.f32.gmra.mrb[12].mxu0 %v2477_v49 }
 0x248   : > { %2072 = vmatprep.mubr.f32.mxu0 %v2479_v50 }
 0x24b   : > { %2073 = vmatmul.mubr.f32.gmra.mrb[14].mxu0 %v2481_v51  ;;  %v1023_v51 = vld [vmem:[#allocation4 + $0x28] sm:$0xff] }
 0x28d   : > { %v1257_v35 = vpop.permute.xlu0 %1256  ;;  %v1267_v36 = vpop.permute.xlu1 %1266 }
 0x291   : > { %v1262_v44 = vpop.permute.xlu0 %1261  ;;  %v1272_v46 = vpop.permute.xlu1 %1271 }
 0x295   : > { %v1277_v62 = vpop.permute.xlu0 %1276  ;;  %v1282_v7 = vpop.permute.xlu1 %1281 }
 0x299   : > { %v1287_v58 = vpop.permute.xlu0 %1286  ;;  %v1292_v0 = vpop.permute.xlu1 %1291 }
 0x29d   : > { %v1297_v60 = vpop.permute.xlu0 %1296  ;;  %v1302_v23 = vpop.permute.xlu1 %1301 }
 0x302   : > { %v2053_v39 = vpop.f32.mrb[0].mxu0 }
 0x303   : > { %v1197_v40 = vadd.f32 %v2053_v39, %v1019_v37  ;;  %v1117_v41 = vpop.f32.mrb[1].mxu0 }
 0x304   : > { %v1196_v42 = vadd.f32 %v1117_v41, %v1018_v38 }
 0x305   : > { %1214 = vst.msk [vmem:[#allocation4 + $0x8] sm:$0xff] %vm1000_vm3, %v1197_v40  ;;  %v1033_v40 = vld [vmem:[#allocation4 + $0x78] sm:$0xff] }
 0x306   : > { %1213 = vst.msk [vmem:[#allocation4] sm:$0xff] %vm1000_vm3, %v1196_v42  ;;  %v2056_v47 = vpop.f32.mrb[2].mxu0  ;;  %v1307_v42 = vpop.permute.xlu0 %1306 }
 0x307   : > { %v1199_v48 = vadd.f32 %v2056_v47, %v1021_v43  ;;  %v1127_v49 = vpop.f32.mrb[3].mxu0  ;;  %v1032_v43 = vld [vmem:[#allocation4 + $0x70] sm:$0xff] }
 0x308   : > { %v1198_v50 = vadd.f32 %v1127_v49, %v1020_v45  ;;  %v1312_v45 = vpop.permute.xlu1 %1311 }
 0x309   : > { %1216 = vst.msk [vmem:[#allocation4 + $0x18] sm:$0xff] %vm1000_vm3, %v1199_v48 }
 0x30a   : > { %1215 = vst.msk [vmem:[#allocation4 + $0x10] sm:$0xff] %vm1000_vm3, %v1198_v50  ;;  %v2059_v57 = vpop.f32.mrb[4].mxu0 }
 0x30b   : > { %v1201_v63 = vadd.f32 %v2059_v57, %v1023_v51  ;;  %v1137_v3 = vpop.f32.mrb[5].mxu0 }
 0x30c   : > { %v1200_v11 = vadd.f32 %v1137_v3, %v1022_v53  ;;  %v1239_v20 = vld [vmem:[#allocation4 + $0x8] sm:$0xff] }
 0x30d   : > { %1218 = vst.msk [vmem:[#allocation4 + $0x28] sm:$0xff] %vm1000_vm3, %v1201_v63  ;;  %v1238_v10 = vld [vmem:[#allocation4] sm:$0xff]  ;;  %v1335_v52 = vmul.f32 %v1262_v44, %v1239_v20  ;;  %v1317_v63 = vpop.permute.xlu0 %1316 }
 0x30e   : > { %1217 = vst.msk [vmem:[#allocation4 + $0x20] sm:$0xff] %vm1000_vm3, %v1200_v11  ;;  %v2062_v12 = vpop.f32.mrb[6].mxu0  ;;  %v1334_v1 = vmul.f32 %v1257_v35, %v1238_v10 }
 0x30f   : > { %v1203_v6 = vadd.f32 %v2062_v12, %v1025_v18  ;;  %v1147_v13 = vpop.f32.mrb[7].mxu0 }
 0x310   : > { %v1202_v55 = vadd.f32 %v1147_v13, %v1024_v56  ;;  %2083 = vmatprep.mubr.msk.f32.mxu1 %vm1000_vm3, %v1334_v1  ;;  %v1241_v24 = vld [vmem:[#allocation4 + $0x18] sm:$0xff] }
 0x311   : > { %1220 = vst.msk [vmem:[#allocation4 + $0x38] sm:$0xff] %vm1000_vm3, %v1203_v6  ;;  %2084 = vmatmul.mubr.msk.f32.vlgmr.msra.gmra.mrb[0].mxu1 %vm1000_vm3, %v1335_v52  ;;  %v1240_v4 = vld [vmem:[#allocation4 + $0x10] sm:$0xff]  ;;  %v1337_v31 = vmul.f32 %v1272_v46, %v1241_v24  ;;  %v1327_v12 = vpop.permute.xlu0 %1326  ;;  %v2295_v24 = vmov 0.0|0.0  }
 0x312   : > { %1219 = vst.msk [vmem:[#allocation4 + $0x30] sm:$0xff] %vm1000_vm3, %v1202_v55  ;;  %v2065_v25 = vpop.f32.mrb[8].mxu0  ;;  %v1336_v26 = vmul.f32 %v1267_v36, %v1240_v4  ;;  %v1608_v55 = vld [vmem:[%s2882_s5] sm:$0xff]  ;;  %2190 = vmatprep.subr.bf16.mxu1 %v2295_v24  ;;  %v1611_v4 = vld [vmem:[%s2882_s5 + $0x18] sm:$0xff] }
 0x313   : > { %v1205_v27 = vadd.f32 %v2065_v25, %v1027_v17  ;;  %v1157_v2 = vpop.f32.mrb[9].mxu0  ;;  %v1609_v17 = vld [vmem:[%s2882_s5 + $0x8] sm:$0xff] }
 0x314   : > { %v1204_v5 = vadd.f32 %v1157_v2, %v1026_v19  ;;  %2086 = vmatprep.mubr.msk.f32.mxu1 %vm1000_vm3, %v1336_v26  ;;  %v1243_v8 = vld [vmem:[#allocation4 + $0x28] sm:$0xff]  ;;  %v1610_v19 = vld [vmem:[%s2882_s5 + $0x10] sm:$0xff] }
 0x315   : > { %1222 = vst.msk [vmem:[#allocation4 + $0x48] sm:$0xff] %vm1000_vm3, %v1205_v27  ;;  %2087 = vmatmul.mubr.msk.f32.gmra.mrb[2].mxu1 %vm1000_vm3, %v1337_v31  ;;  %v1242_v59 = vld [vmem:[#allocation4 + $0x20] sm:$0xff]  ;;  %v1339_v61 = vmul.f32 %v1282_v7, %v1243_v8  ;;  %v1322_v7 = vpop.permute.xlu1 %1321 }
 0x316   : > { %1221 = vst.msk [vmem:[#allocation4 + $0x40] sm:$0xff] %vm1000_vm3, %v1204_v5  ;;  %v2068_v9 = vpop.f32.mrb[10].mxu0  ;;  %v1338_v15 = vmul.f32 %v1277_v62, %v1242_v59 }
 0x317   : > { %v1207_v16 = vadd.f32 %v2068_v9, %v1029_v54  ;;  %v1167_v21 = vpop.f32.mrb[11].mxu0 }
 0x318   : > { %v1206_v28 = vadd.f32 %v1167_v21, %v1028_v14  ;;  %2089 = vmatprep.mubr.msk.f32.mxu1 %vm1000_vm3, %v1338_v15  ;;  %v1245_v30 = vld [vmem:[#allocation4 + $0x38] sm:$0xff] }
 0x319   : > { %1224 = vst.msk [vmem:[#allocation4 + $0x58] sm:$0xff] %vm1000_vm3, %v1207_v16  ;;  %2090 = vmatmul.mubr.msk.f32.gmra.mrb[4].mxu1 %vm1000_vm3, %v1339_v61  ;;  %v1244_v33 = vld [vmem:[#allocation4 + $0x30] sm:$0xff]  ;;  %v1341_v38 = vmul.f32 %v1292_v0, %v1245_v30  ;;  %v1332_v6 = vpop.permute.xlu1 %1331  ;;  %v2194_v0 = vpack.c.bf16 %v1611_v4, %v1610_v19 }
 0x31a   : > { %1223 = vst.msk [vmem:[#allocation4 + $0x50] sm:$0xff] %vm1000_vm3, %v1206_v28  ;;  %v2071_v34 = vpop.f32.mrb[12].mxu0  ;;  %v1340_v35 = vmul.f32 %v1287_v58, %v1244_v33  ;;  %v2191_v58 = vpack.c.bf16 %v1609_v17, %v1608_v55 }
 0x31b   : > { %v1209_v36 = vadd.f32 %v2071_v34, %v1031_v29  ;;  %v1177_v37 = vpop.f32.mrb[13].mxu0 }
 0x31c   : > { %v1208_v39 = vadd.f32 %v1177_v37, %v1030_v32  ;;  %2092 = vmatprep.mubr.msk.f32.mxu1 %vm1000_vm3, %v1340_v35  ;;  %v1247_v41 = vld [vmem:[#allocation4 + $0x48] sm:$0xff]  ;;  %2192 = vmatpush3.bf16.msra.mxu1 %v2191_v58 }
 0x31d   : > { %1226 = vst.msk [vmem:[#allocation4 + $0x68] sm:$0xff] %vm1000_vm3, %v1209_v36  ;;  %2093 = vmatmul.mubr.msk.f32.gmra.mrb[6].mxu1 %vm1000_vm3, %v1341_v38  ;;  %v1246_v44 = vld [vmem:[#allocation4 + $0x40] sm:$0xff]  ;;  %v1343_v50 = vmul.f32 %v1302_v23, %v1247_v41  ;;  %2193 = vmatprep.subr.bf16.mxu1 %v2295_v24 }
 0x31e   : > { %1225 = vst.msk [vmem:[#allocation4 + $0x60] sm:$0xff] %vm1000_vm3, %v1208_v39  ;;  %v2074_v46 = vpop.f32.mrb[14].mxu0  ;;  %v1342_v47 = vmul.f32 %v1297_v60, %v1246_v44 }
 0x31f   : > { %v1211_v48 = vadd.f32 %v2074_v46, %v1033_v40  ;;  %v1187_v49 = vpop.f32.mrb[15].mxu0 }
 0x320   : > { %v1210_v51 = vadd.f32 %v1187_v49, %v1032_v43  ;;  %2095 = vmatprep.mubr.msk.f32.mxu1 %vm1000_vm3, %v1342_v47  ;;  %v1249_v53 = vld [vmem:[#allocation4 + $0x58] sm:$0xff]  ;;  %2195 = vmatpush3.bf16.msra.mxu1 %v2194_v0 }
 0x321   : > { %1228 = vst.msk [vmem:[#allocation4 + $0x78] sm:$0xff] %vm1000_vm3, %v1211_v48  ;;  %2096 = vmatmul.mubr.msk.f32.gmra.mrb[8].mxu1 %vm1000_vm3, %v1343_v50  ;;  %v1248_v57 = vld [vmem:[#allocation4 + $0x50] sm:$0xff]  ;;  %v1345_v3 = vmul.f32 %v1312_v45, %v1249_v53 }
 0x322   : > { %1227 = vst.msk [vmem:[#allocation4 + $0x70] sm:$0xff] %vm1000_vm3, %v1210_v51  ;;  %v1344_v62 = vmul.f32 %v1307_v42, %v1248_v57 }
 0x324   : > { %2098 = vmatprep.mubr.msk.f32.mxu1 %vm1000_vm3, %v1344_v62  ;;  %v1251_v11 = vld [vmem:[#allocation4 + $0x68] sm:$0xff] }
 0x325   : > { %2099 = vmatmul.mubr.msk.f32.gmra.mrb[10].mxu1 %vm1000_vm3, %v1345_v3  ;;  %v1250_v18 = vld [vmem:[#allocation4 + $0x60] sm:$0xff]  ;;  %v1347_v56 = vmul.f32 %v1322_v7, %v1251_v11 }
 0x326   : > { %v1346_v20 = vmul.f32 %v1317_v63, %v1250_v18 }
 0x328   : > { %2101 = vmatprep.mubr.msk.f32.mxu1 %vm1000_vm3, %v1346_v20  ;;  %v1253_v10 = vld [vmem:[#allocation4 + $0x78] sm:$0xff] }
 0x329   : > { %2102 = vmatmul.mubr.msk.f32.gmra.mrb[12].mxu1 %vm1000_vm3, %v1347_v56  ;;  %v1252_v1 = vld [vmem:[#allocation4 + $0x70] sm:$0xff]  ;;  %v1349_v52 = vmul.f32 %v1332_v6, %v1253_v10 }
 0x32a   : > { %v1348_v13 = vmul.f32 %v1327_v12, %v1252_v1 }
 0x32c   : > { %2104 = vmatprep.mubr.msk.f32.mxu1 %vm1000_vm3, %v1348_v13 }
 0x32d   : > { %2105 = vmatmul.mubr.msk.f32.gmra.mrb[14].mxu1 %vm1000_vm3, %v1349_v52 }
 0x32e   : > { %2115 = vmatprep.mubr.msk.f32.mxu1 %vm2296_vm5, %v2294_v22 }
 0x3e4   : > { %v2085_v25 = vpop.f32.mrb[0].mxu1 }
 0x3e5   : > { %v1548_v26 = vmax.f32 %v2085_v25, 0.0  ;;  %v1468_v27 = vpop.f32.mrb[1].mxu1 }
 0x3e6   : > { %v1547_v2 = vmax.f32 %v1468_v27, 0.0 }
 0x3e7   : > { %v1565_v31 = vsel %vm1000_vm3, %v1548_v26, 0.0 }
 0x3e8   : > { %v1564_v5 = vsel %vm1000_vm3, %v1547_v2, 0.0  ;;  %v2088_v54 = vpop.f32.mrb[2].mxu1 }
 0x3e9   : > { %v1566_v8 = vadd.f32 %v1565_v31, %v1564_v5  ;;  %v1478_v14 = vpop.f32.mrb[3].mxu1  ;;  %v1550_v59 = vmax.f32 %v2088_v54, 0.0  ;;  %v1563_v31 = vld [vmem:[#allocation5] sm:$0x1] }
 0x3ea   : > { %v1549_v9 = vmax.f32 %v1478_v14, 0.0  ;;  %v1612_v14 = vld [vmem:[%s2883_s6] sm:$0x1] }
 0x3eb   : > { %v1569_v22 = vsel %vm1000_vm3, %v1550_v59, 0.0 }
 0x3ec   : > { %v1567_v15 = vsel %vm1000_vm3, %v1549_v9, 0.0  ;;  %v2091_v60 = vpop.f32.mrb[4].mxu1 }
 0x3ed   : > { %v1568_v16 = vadd.f32 %v1567_v15, %v1566_v8  ;;  %v1488_v21 = vpop.f32.mrb[5].mxu1  ;;  %v1552_v61 = vmax.f32 %v2091_v60, 0.0 }
 0x3ee   : > { %v1551_v23 = vmax.f32 %v1488_v21, 0.0 }
 0x3ef   : > { %v1570_v28 = vadd.f32 %v1569_v22, %v1568_v16  ;;  %v1573_v34 = vsel %vm1000_vm3, %v1552_v61, 0.0 }
 0x3f0   : > { %v1571_v29 = vsel %vm1000_vm3, %v1551_v23, 0.0  ;;  %v2094_v30 = vpop.f32.mrb[6].mxu1 }
 0x3f1   : > { %v1572_v32 = vadd.f32 %v1571_v29, %v1570_v28  ;;  %v1498_v33 = vpop.f32.mrb[7].mxu1  ;;  %v1554_v35 = vmax.f32 %v2094_v30, 0.0 }
 0x3f2   : > { %v1553_v36 = vmax.f32 %v1498_v33, 0.0 }
 0x3f3   : > { %v1574_v37 = vadd.f32 %v1573_v34, %v1572_v32  ;;  %v1577_v42 = vsel %vm1000_vm3, %v1554_v35, 0.0 }
 0x3f4   : > { %v1575_v38 = vsel %vm1000_vm3, %v1553_v36, 0.0  ;;  %v2097_v39 = vpop.f32.mrb[8].mxu1 }
 0x3f5   : > { %v1576_v40 = vadd.f32 %v1575_v38, %v1574_v37  ;;  %v1508_v41 = vpop.f32.mrb[9].mxu1  ;;  %v1556_v43 = vmax.f32 %v2097_v39, 0.0 }
 0x3f6   : > { %v1555_v44 = vmax.f32 %v1508_v41, 0.0 }
 0x3f7   : > { %v1578_v45 = vadd.f32 %v1577_v42, %v1576_v40  ;;  %v1581_v50 = vsel %vm1000_vm3, %v1556_v43, 0.0 }
 0x3f8   : > { %v1579_v46 = vsel %vm1000_vm3, %v1555_v44, 0.0  ;;  %v2100_v47 = vpop.f32.mrb[10].mxu1 }
 0x3f9   : > { %v1580_v48 = vadd.f32 %v1579_v46, %v1578_v45  ;;  %v1518_v49 = vpop.f32.mrb[11].mxu1  ;;  %v1558_v51 = vmax.f32 %v2100_v47, 0.0 }
 0x3fa   : > { %v1557_v53 = vmax.f32 %v1518_v49, 0.0 }
 0x3fb   : > { %v1582_v57 = vadd.f32 %v1581_v50, %v1580_v48  ;;  %v1585_v11 = vsel %vm1000_vm3, %v1558_v51, 0.0 }
 0x3fc   : > { %v1583_v62 = vsel %vm1000_vm3, %v1557_v53, 0.0  ;;  %v2103_v63 = vpop.f32.mrb[12].mxu1 }
 0x3fd   : > { %v1584_v3 = vadd.f32 %v1583_v62, %v1582_v57  ;;  %v1528_v7 = vpop.f32.mrb[13].mxu1  ;;  %v1560_v18 = vmax.f32 %v2103_v63, 0.0 }
 0x3fe   : > { %v1559_v20 = vmax.f32 %v1528_v7, 0.0 }
 0x3ff   : > { %v1586_v56 = vadd.f32 %v1585_v11, %v1584_v3  ;;  %v1589_v13 = vsel %vm1000_vm3, %v1560_v18, 0.0 }
 0x400   : > { %v1587_v10 = vsel %vm1000_vm3, %v1559_v20, 0.0  ;;  %v2106_v12 = vpop.f32.mrb[14].mxu1 }
 0x401   : > { %v1588_v1 = vadd.f32 %v1587_v10, %v1586_v56  ;;  %v1538_v6 = vpop.f32.mrb[15].mxu1  ;;  %v1562_v52 = vmax.f32 %v2106_v12, 0.0 }
 0x402   : > { %v1561_v55 = vmax.f32 %v1538_v6, 0.0 }
 0x403   : > { %v1590_v17 = vadd.f32 %v1589_v13, %v1588_v1  ;;  %v1593_v19 = vsel %vm1000_vm3, %v1562_v52, 0.0 }
 0x404   : > { %v1591_v24 = vsel %vm1000_vm3, %v1561_v55, 0.0 }
 0x405   : > { %v1592_v58 = vadd.f32 %v1591_v24, %v1590_v17 }
 0x407   : > { %v1594_v4 = vadd.f32 %v1593_v19, %v1592_v58 }
 0x409   : > { %v1595_v0 = vrot.slane %v1594_v4, 4 }
 0x40b   : > { %v1596_v25 = vadd.f32 %v1595_v0, %v1594_v4 }
 0x40d   : > { %v1597_v26 = vrot.slane %v1596_v25, 2 }
 0x40f   : > { %v1598_v27 = vadd.f32 %v1597_v26, %v1596_v25 }
 0x411   : > { %v1599_v2 = vrot.slane %v1598_v27, 1 }
 0x413   : > { %v1600_v5 = vadd.f32 %v1599_v2, %v1598_v27 }
 0x415   : > { %v1601_v54 = vadd.f32 %v1600_v5, %v1563_v31 }
 0x417   : > { %1603 = vst.msk [vmem:[#allocation5] sm:$0x1] %vm1236_vm4, %v1601_v54 }
 0x41e   : > { %v1607_v8 = vld [vmem:[#allocation5] sm:$0x1] }
 0x41f   : > { %2116 = vmatmul.mubr.msk.f32.vlgmr.msra.gmra.mrb[16].mxu1 %vm1000_vm3, %v1607_v8 }
 0x4f2   : > { %v1682_v59 = vpop.f32.mrb[16].mxu1 }
 0x4f3   : > { %v1683_v9 = vadd.f32 %v1682_v59, %v1612_v14  ;;  %v2117_v15 = vpop.f32.mrb[17].mxu1 }
 0x4f5   : > { %1686 = vst [vmem:[#allocation6] sm:$0x1] %v1683_v9 }
 0x4f6 PF: > { %p2842_p6 = scmp.eq.s32.totalorder %s1785_s27, 1  ;;  %s2297_s24 = smov [#allocation6]  }
 0x4f7   : > { %s1694_s8 = sshll.u32 %s2297_s24, 4  ;;  %s1695_s8 = int_to_ptr.vmem [resolvable:$true] %s1694_s8 }
 0x4f8   : > { %s2237_s9 = scalar_lea.vmem %s1695_s8, 16  ;;  %s2243_s10 = scalar_lea.vmem %s1695_s8, 32 }
 0x4f9   : > { %p2238_p7 = scmp.ne.s32.totalorder %s1695_s8, %s2237_s9  ;;  %p2244_p10 = scmp.lt.s32.totalorder %s1695_s8, %s1695_s8 }
 0x4fa   : > { %p2245_p11 = scmp.lt.s32.totalorder %s2243_s10, %s2237_s9 }
 0x4fb   : > { %p2239_p8 = pnand %p2238_p7, %p2842_p6 }
 0x4fc   : > { %p2246_p12 = por %p2245_p11, %p2244_p10 }
 0x4fd   : > { %p2240_p9 = pneg %p2239_p8 }
 0x4ff   : > { %p2247_p13 = pnand %p2246_p12, %p2240_p9 }
 0x501   : > { %2250 = shalt.err (!%p2247_p13)
}
 0x502   : > { %s2251_s12 = scalar_lea.hbm %s2884_s7, 16 }
 0x503   : > { %p2252_p0 = scmp.ne.s32.totalorder %s2884_s7, %s2251_s12  ;;  %p2257_p3 = scmp.lt.u32.totalorder %s2251_s12, %s2884_s7 }
 0x505   : > { %p2253_p1 = pnand %p2252_p0, %p2842_p6 }
 0x507   : > { %p2254_p2 = pneg %p2253_p1 }
 0x509   : > { %p2259_p4 = pnand %p2257_p3, %p2254_p2 }
 0x50b   : > { %2262 = shalt.err (!%p2259_p4)
}
 0x50c   : > { %2197 = dma.vmem_to_hbm [thread:$0]  (%p2842_p6), %s1695_s8, 16, %s2884_s7, [#allocation7]  }
 0x50d   : > { %2276 = dma.done.wait (%p2842_p6), [#allocation7], 16  }
 0x50e   : > { %2278 = vsyncadd (%p2842_p6), [#allocation7], 4294967280 }
 0x50f PF: > { %s18_s26 = sadd.s32 1, %s2289_s26   ;;  %s2886_s24 = smov %s2285_s25 }
 0x510   : > { %p15_p5 = scmp.ge.s32.totalorder %s18_s26, 4   ;;  %s2887_s25 = smov %s2889_s28 }
 0x512   :  { %17 = sbr.rel (!%p15_p5) target bundleno = 2 (0x2), region = 115 }
 0x519   :  { %1707 = vsyncpa [#allocation7], 1 }
 0x51a   :  { %1709 = vsyncpa [#allocation7 + $0x1], 1 }

</bundles_post_ra>
